<compile_context>
chip_gen: v5e
topology: v5e:2x2
jax: 0.10.0
libtpu: 0.0.40
codegen_flags: <defaults>
</compile_context>

<pallas_src>
import functools

import jax
import jax.numpy as jnp
from jax.experimental import pallas as pl
from jax.experimental.pallas import tpu as pltpu


def _rmsnorm(x, w, eps):
    # x: (N, D) f32, w: (1, D) f32
    var = jnp.mean(x * x, axis=-1, keepdims=True)
    return x * jax.lax.rsqrt(var + eps) * w


def block_seq_kernel(
    bias_ref, x_ref, n1_ref, wqkv_ref, wproj_ref, n2_ref, wfc1_ref, wfc2_ref,
    out_ref, carry_ref, att_ref,
    *, q_heads, kv_heads, head_dim, num_blocks, eps,
):
    # program ids only at the top level of the kernel body (never inside pl.when).
    blk = pl.program_id(1)
    group = q_heads // kv_heads
    bt, S, D = out_ref.shape
    hd = head_dim

    # First block step of this batch tile: copy the auto-pipelined activations into
    # the VMEM carry; the carry then stays resident for all remaining blocks.
    @pl.when(blk == 0)
    def _():
        carry_ref[...] = x_ref[...].reshape(bt * S, D)

    x = carry_ref[...]                                     # (bt*S, D) f32

    # ------------------------------ attention ------------------------------
    h = _rmsnorm(x, n1_ref[...], eps).astype(jnp.bfloat16)
    # One QKV matmul with M = bt*S rows, bf16 operands, f32 accumulation.
    qkv = jnp.dot(h, wqkv_ref[...], preferred_element_type=jnp.float32)
    qkv = qkv.astype(jnp.bfloat16).reshape(bt, S, (q_heads + 2 * kv_heads) * hd)

    # Per-head attention; heads write into a bf16 VMEM slab so the output projection
    # below is ONE K=D matmul instead of q_heads tiny K=head_dim matmuls.
    for g in range(kv_heads):
        k_lo = (q_heads + g) * hd
        v_lo = (q_heads + kv_heads + g) * hd
        k_g = qkv[:, :, k_lo:k_lo + hd]                    # (bt, S, hd) bf16
        v_g = qkv[:, :, v_lo:v_lo + hd]                    # (bt, S, hd) bf16
        for j in range(group):
            hq = g * group + j
            q_h = qkv[:, :, hq * hd:(hq + 1) * hd]         # (bt, S, hd) bf16
            s = jnp.einsum("bqd,bkd->bqk", q_h, k_g,
                           preferred_element_type=jnp.float32)      # (bt, S, S) f32
            s = s + bias_ref[hq][None, :, :]               # fused ALiBi + causal/window
            m = jnp.max(s, axis=-1, keepdims=True)
            p = jnp.exp(s - m)
            p = p / jnp.sum(p, axis=-1, keepdims=True)
            o = jnp.einsum("bqk,bkd->bqd", p.astype(jnp.bfloat16), v_g,
                           preferred_element_type=jnp.float32)      # (bt, S, hd) f32
            att_ref[:, hq * hd:(hq + 1) * hd] = (
                o.reshape(bt * S, hd).astype(jnp.bfloat16))

    # Single output projection (K = q_heads*head_dim = D) + one residual add.
    x = x + jnp.dot(att_ref[...], wproj_ref[...], preferred_element_type=jnp.float32)

    # ------------------------------ SwiGLU ------------------------------
    h2 = _rmsnorm(x, n2_ref[...], eps).astype(jnp.bfloat16)
    f = jnp.dot(h2, wfc1_ref[...], preferred_element_type=jnp.float32)  # (bt*S, 2D)
    a = f[:, :D]
    gate = f[:, D:]
    glu = (a * (gate * jax.nn.sigmoid(gate))).astype(jnp.bfloat16)
    x = x + jnp.dot(glu, wfc2_ref[...], preferred_element_type=jnp.float32)

    carry_ref[...] = x

    @pl.when(blk == num_blocks - 1)
    def _():
        out_ref[...] = x.reshape(bt, S, D)


def block_seq_forward(x, params, *, q_heads, kv_heads, window_size, batch_tile=None):
    """params: dict of per-block-stacked f32 weights (leading dim = num_blocks)."""
    B, S, D = x.shape
    num_blocks = params["wqkv"].shape[0]
    head_dim = D // q_heads
    qkv_out = (q_heads + 2 * kv_heads) * head_dim
    eps = float(jnp.finfo(jnp.float32).eps)

    if batch_tile is None:
        batch_tile = B        # fold the full batch -> weights streamed once per block
    assert B % batch_tile == 0
    n_bt = B // batch_tile

    # Fold 1/sqrt(head_dim) into the Q columns of the fused QKV weight (one-time).
    scale = 1.0 / (head_dim ** 0.5)
    col_scale = jnp.concatenate(
        [jnp.full((q_heads * head_dim,), scale, jnp.float32),
         jnp.ones((2 * kv_heads * head_dim,), jnp.float32)])
    wqkv = (params["wqkv"] * col_scale[None, None, :]).astype(jnp.bfloat16)
    wproj = params["wproj"].astype(jnp.bfloat16)
    wfc1 = params["wfc1"].astype(jnp.bfloat16)
    wfc2 = params["wfc2"].astype(jnp.bfloat16)

    # Grid-invariant fused ALiBi + causal + sliding-window additive bias per q head.
    slopes = jnp.array([2.0 ** (-((h + 1) * 8.0 / q_heads)) for h in range(q_heads)],
                       dtype=jnp.float32)
    q_idx = jnp.arange(S)[:, None]
    k_idx = jnp.arange(S)[None, :]
    allowed = k_idx <= q_idx
    if window_size >= 0:
        allowed = allowed & ((q_idx - k_idx) <= window_size)
    dist = (q_idx - k_idx).astype(jnp.float32)
    bias = jnp.where(allowed[None, :, :],
                     -slopes[:, None, None] * dist[None, :, :],
                     jnp.float32(-1e30))                   # (q_heads, S, S)

    kernel = functools.partial(
        block_seq_kernel,
        q_heads=q_heads, kv_heads=kv_heads, head_dim=head_dim,
        num_blocks=num_blocks, eps=eps)

    out = pl.pallas_call(
        kernel,
        out_shape=jax.ShapeDtypeStruct((B, S, D), jnp.float32),
        grid=(n_bt, num_blocks),
        in_specs=[
            # fused bias: VMEM resident (constant index map)
            pl.BlockSpec((q_heads, S, S), lambda b, i: (0, 0, 0)),
            # activations: auto-pipelined, copied into the carry at blk == 0
            pl.BlockSpec((batch_tile, S, D), lambda b, i: (b, 0, 0)),
            # per-block weights: index map ignores the batch-tile axis, so each
            # block's weights are DMA'd once per block, not once per batch row.
            pl.BlockSpec((None, 1, D), lambda b, i: (i, 0, 0)),                # norm1 w
            pl.BlockSpec((None, D, qkv_out), lambda b, i: (i, 0, 0)),          # qkv W^T
            pl.BlockSpec((None, q_heads * head_dim, D), lambda b, i: (i, 0, 0)),  # proj W^T
            pl.BlockSpec((None, 1, D), lambda b, i: (i, 0, 0)),                # norm2 w
            pl.BlockSpec((None, D, 2 * D), lambda b, i: (i, 0, 0)),            # fc1 W^T
            pl.BlockSpec((None, D, D), lambda b, i: (i, 0, 0)),                # fc2 W^T
        ],
        out_specs=pl.BlockSpec((batch_tile, S, D), lambda b, i: (b, 0, 0)),
        scratch_shapes=[
            pltpu.VMEM((batch_tile * S, D), jnp.float32),                      # carry
            pltpu.VMEM((batch_tile * S, q_heads * head_dim), jnp.bfloat16),    # att slab
        ],
        compiler_params=pltpu.CompilerParams(
            dimension_semantics=("parallel", "arbitrary")),
    )(bias, x, params["n1"], wqkv, wproj, params["n2"], wfc1, wfc2)

    # Module is in (default) training mode -> kv caches are None per block.
    next_kv_caches = [None] * num_blocks
    return out, next_kv_caches


# ---------------- pure-JAX f32 reference (for correctness check) ----------------
def block_seq_reference(x, params, *, q_heads, kv_heads, window_size):
    B, S, D = x.shape
    num_blocks = params["wqkv"].shape[0]
    head_dim = D // q_heads
    eps = float(jnp.finfo(jnp.float32).eps)
    slopes = jnp.array([2.0 ** (-((h + 1) * 8.0 / q_heads)) for h in range(q_heads)],
                       dtype=jnp.float32)
    group = q_heads // kv_heads

    def rms(v, w):
        return v * jax.lax.rsqrt(jnp.mean(v * v, -1, keepdims=True) + eps) * w

    q_idx = jnp.arange(S)[:, None]
    k_idx = jnp.arange(S)[None, :]
    allowed = k_idx <= q_idx
    if window_size >= 0:
        allowed = allowed & ((q_idx - k_idx) <= window_size)
    dist = (q_idx - k_idx).astype(jnp.float32)

    for i in range(num_blocks):
        h = rms(x, params["n1"][i])
        qkv = h @ params["wqkv"][i]
        qkv = qkv.reshape(B, S, q_heads + 2 * kv_heads, head_dim)
        q, k, v = jnp.split(qkv, [q_heads, q_heads + kv_heads], axis=2)
        outs = []
        for hq in range(q_heads):
            g = hq // group
            s = jnp.einsum("bqd,bkd->bqk", q[:, :, hq], k[:, :, g]) / (head_dim ** 0.5)
            s = s - slopes[hq] * dist
            s = jnp.where(allowed, s, -jnp.inf)
            p = jax.nn.softmax(s, axis=-1)
            outs.append(jnp.einsum("bqk,bkd->bqd", p, v[:, :, g]))
        att = jnp.concatenate(outs, -1) @ params["wproj"][i]
        x = x + att
        h2 = rms(x, params["n2"][i])
        f = h2 @ params["wfc1"][i]
        a, gate = f[..., :D], f[..., D:]
        x = x + (jax.nn.silu(gate) * a) @ params["wfc2"][i]
    return x


if __name__ == "__main__":
    num_blocks, dim = 2, 32
    q_heads, kv_heads, window_size = 4, 2, 4
    batch, seq = 2, 8
    head_dim = dim // q_heads
    qkv_out = (q_heads + 2 * kv_heads) * head_dim

    key = jax.random.PRNGKey(0)
    ks = jax.random.split(key, 6)
    x = jax.random.normal(ks[0], (batch, seq, dim), dtype=jnp.float32)

    params = {
        # RMSNorm weights initialized to ones (matches nn.RMSNorm default init)
        "n1": jnp.ones((num_blocks, 1, dim), jnp.float32),
        "n2": jnp.ones((num_blocks, 1, dim), jnp.float32),
        # Linear weights, already transposed to (in, out)
        "wqkv": 0.1 * jax.random.normal(ks[1], (num_blocks, dim, qkv_out), jnp.float32),
        "wproj": 0.1 * jax.random.normal(ks[2], (num_blocks, q_heads * head_dim, dim), jnp.float32),
        "wfc1": 0.1 * jax.random.normal(ks[3], (num_blocks, dim, 2 * dim), jnp.float32),
        "wfc2": 0.1 * jax.random.normal(ks[4], (num_blocks, dim, dim), jnp.float32),
    }

    out, kv_caches = block_seq_forward(
        x, params, q_heads=q_heads, kv_heads=kv_heads, window_size=window_size)
    out = jax.block_until_ready(out)

    ref = block_seq_reference(
        x, params, q_heads=q_heads, kv_heads=kv_heads, window_size=window_size)
    assert out.shape == (batch, seq, dim)
    assert kv_caches == [None] * num_blocks
    # bf16 matmul operands (f32 accumulation) vs pure-f32 reference -> relaxed tol.
    assert jnp.allclose(out, ref, atol=5e-2, rtol=5e-2), "mismatch vs JAX reference"

    print("KERNEL_OK")
</pallas_src>

<mosaic_0001>
module attributes {stable_mosaic.version = 11 : i64} {
  func.func @block_seq_kernel(%arg0: i32, %arg1: i32, %arg2: memref<4x8x8xf32, #tpu.memory_space<vmem>>, %arg3: memref<2x8x32xf32, #tpu.memory_space<vmem>>, %arg4: memref<1x1x32xf32, #tpu.memory_space<vmem>>, %arg5: memref<1x32x64xbf16, #tpu.memory_space<vmem>>, %arg6: memref<1x32x32xbf16, #tpu.memory_space<vmem>>, %arg7: memref<1x1x32xf32, #tpu.memory_space<vmem>>, %arg8: memref<1x32x64xbf16, #tpu.memory_space<vmem>>, %arg9: memref<1x32x32xbf16, #tpu.memory_space<vmem>>, %arg10: memref<2x8x32xf32, #tpu.memory_space<vmem>>, %arg11: memref<16x32xf32, #tpu.memory_space<vmem>>, %arg12: memref<16x32xbf16, #tpu.memory_space<vmem>>) attributes {dimension_semantics = [#tpu.dimension_semantics<parallel>, #tpu.dimension_semantics<arbitrary>], iteration_bounds = array<i64: 1, 2>, scalar_prefetch = 0 : i64, scratch_operands = 2 : i64, tpu.core_type = #tpu.core_type<tc>, window_params = [{pipeline_mode = #tpu.pipeline_mode<synchronous>, transform_indices = @transform_0, window_bounds = array<i64: 4, 8, 8>}, {transform_indices = @transform_1, window_bounds = array<i64: 2, 8, 32>}, {transform_indices = @transform_2, window_bounds = array<i64: 1, 1, 32>}, {transform_indices = @transform_3, window_bounds = array<i64: 1, 32, 64>}, {transform_indices = @transform_4, window_bounds = array<i64: 1, 32, 32>}, {transform_indices = @transform_5, window_bounds = array<i64: 1, 1, 32>}, {transform_indices = @transform_6, window_bounds = array<i64: 1, 32, 64>}, {transform_indices = @transform_7, window_bounds = array<i64: 1, 32, 32>}, {transform_indices = @transform_8, window_bounds = array<i64: 2, 8, 32>}]} {
    %c0_i32 = arith.constant 0 : i32
    %0 = arith.cmpi eq, %arg1, %c0_i32 : i32
    %1 = arith.extui %0 : i1 to i32
    %c0_i32_0 = arith.constant 0 : i32
    %2 = arith.cmpi ne, %1, %c0_i32_0 : i32
    scf.if %2 {
      %c0_65 = arith.constant 0 : index
      %c0_66 = arith.constant 0 : index
      %c0_67 = arith.constant 0 : index
      %153 = vector.load %arg3[%c0_65, %c0_66, %c0_67] : memref<2x8x32xf32, #tpu.memory_space<vmem>>, vector<2x8x32xf32>
      %154 = vector.shape_cast %153 : vector<2x8x32xf32> to vector<16x32xf32>
      %c0_68 = arith.constant 0 : index
      %c0_69 = arith.constant 0 : index
      %155 = vector.load %arg11[%c0_68, %c0_69] : memref<16x32xf32, #tpu.memory_space<vmem>>, vector<16x32xf32>
      tpu.vector_store %arg11[%c0_68, %c0_69], %154 {strides = array<i32>} : memref<16x32xf32, #tpu.memory_space<vmem>>, vector<16x32xf32>,
    } else {
    }
    %c0 = arith.constant 0 : index
    %c0_1 = arith.constant 0 : index
    %3 = vector.load %arg11[%c0, %c0_1] : memref<16x32xf32, #tpu.memory_space<vmem>>, vector<16x32xf32>
    %c0_2 = arith.constant 0 : index
    %c0_3 = arith.constant 0 : index
    %c0_4 = arith.constant 0 : index
    %4 = vector.load %arg4[%c0_2, %c0_3, %c0_4] : memref<1x1x32xf32, #tpu.memory_space<vmem>>, vector<1x1x32xf32>
    %5 = vector.shape_cast %4 : vector<1x1x32xf32> to vector<1x32xf32>
    %6 = arith.mulf %3, %3 : vector<16x32xf32>
    %cst = arith.constant dense<0.000000e+00> : vector<16xf32>
    %7 = vector.multi_reduction <add>, %6, %cst [1] : vector<16x32xf32> to vector<16xf32>
    %8 = vector.shape_cast %7 : vector<16xf32> to vector<16x1xf32>
    %cst_5 = arith.constant 3.200000e+01 : f32
    %9 = vector.broadcast %cst_5 : f32 to vector<16x1xf32>
    %10 = arith.divf %8, %9 : vector<16x1xf32>
    %cst_6 = arith.constant 1.1920929E-7 : f32
    %11 = vector.broadcast %cst_6 : f32 to vector<16x1xf32>
    %12 = arith.addf %10, %11 : vector<16x1xf32>
    %13 = math.rsqrt %12 : vector<16x1xf32>
    %14 = vector.broadcast %13 : vector<16x1xf32> to vector<16x32xf32>
    %15 = arith.mulf %3, %14 : vector<16x32xf32>
    %16 = vector.broadcast %5 : vector<1x32xf32> to vector<16x32xf32>
    %17 = arith.mulf %15, %16 : vector<16x32xf32>
    %18 = arith.truncf %17 : vector<16x32xf32> to vector<16x32xbf16>
    %c0_7 = arith.constant 0 : index
    %c0_8 = arith.constant 0 : index
    %c0_9 = arith.constant 0 : index
    %19 = vector.load %arg5[%c0_7, %c0_8, %c0_9] : memref<1x32x64xbf16, #tpu.memory_space<vmem>>, vector<1x32x64xbf16>
    %20 = vector.shape_cast %19 : vector<1x32x64xbf16> to vector<32x64xbf16>
    %cst_10 = arith.constant dense<0.000000e+00> : vector<16x64xf32>
    %21 = tpu.matmul %18, %20, %cst_10 {dimension_numbers = #tpu.dot_dimension_numbers<[1], [0], [0], [1], [0, 0, 1, 1], [], []>} : vector<16x32xbf16>, vector<32x64xbf16>, vector<16x64xf32> -> vector<16x64xf32>
    %22 = arith.truncf %21 : vector<16x64xf32> to vector<16x64xbf16>
    %23 = vector.shape_cast %22 : vector<16x64xbf16> to vector<2x8x64xbf16>
    %24 = vector.extract_strided_slice %23 {offsets = [0, 0, 32], sizes = [2, 8, 8], strides = [1, 1, 1]} : vector<2x8x64xbf16> to vector<2x8x8xbf16>
    %25 = vector.extract_strided_slice %23 {offsets = [0, 0, 48], sizes = [2, 8, 8], strides = [1, 1, 1]} : vector<2x8x64xbf16> to vector<2x8x8xbf16>
    %26 = vector.extract_strided_slice %23 {offsets = [0, 0, 0], sizes = [2, 8, 8], strides = [1, 1, 1]} : vector<2x8x64xbf16> to vector<2x8x8xbf16>
    "tpu.trace_start"() <{level = 10 : i32, message = "bqd,bkd->bqk"}> : () -> ()
    %cst_11 = arith.constant dense<0.000000e+00> : vector<2x8x8xf32>
    %27 = tpu.matmul %26, %24, %cst_11 {dimension_numbers = #tpu.dot_dimension_numbers<[2], [2], [1], [1], [0, 0, 0, 1, 1, 1], [0], [0]>} : vector<2x8x8xbf16>, vector<2x8x8xbf16>, vector<2x8x8xf32> -> vector<2x8x8xf32>
    "tpu.trace_stop"() : () -> ()
    %c0_12 = arith.constant 0 : index
    %c0_13 = arith.constant 0 : index
    %c0_14 = arith.constant 0 : index
    %28 = vector.load %arg2[%c0_12, %c0_13, %c0_14] : memref<4x8x8xf32, #tpu.memory_space<vmem>>, vector<1x8x8xf32>
    %29 = vector.shape_cast %28 : vector<1x8x8xf32> to vector<8x8xf32>
    %30 = vector.shape_cast %29 : vector<8x8xf32> to vector<1x8x8xf32>
    %31 = vector.broadcast %30 : vector<1x8x8xf32> to vector<2x8x8xf32>
    %32 = arith.addf %27, %31 : vector<2x8x8xf32>
    %cst_15 = arith.constant dense<0xFF800000> : vector<2x8xf32>
    %33 = vector.multi_reduction <maximumf>, %32, %cst_15 [2] : vector<2x8x8xf32> to vector<2x8xf32>
    %34 = vector.shape_cast %33 : vector<2x8xf32> to vector<2x8x1xf32>
    %35 = vector.broadcast %34 : vector<2x8x1xf32> to vector<2x8x8xf32>
    %36 = arith.subf %32, %35 : vector<2x8x8xf32>
    %37 = math.exp %36 : vector<2x8x8xf32>
    %cst_16 = arith.constant dense<0.000000e+00> : vector<2x8xf32>
    %38 = vector.multi_reduction <add>, %37, %cst_16 [2] : vector<2x8x8xf32> to vector<2x8xf32>
    %39 = vector.shape_cast %38 : vector<2x8xf32> to vector<2x8x1xf32>
    %40 = vector.broadcast %39 : vector<2x8x1xf32> to vector<2x8x8xf32>
    %41 = arith.divf %37, %40 : vector<2x8x8xf32>
    %42 = arith.truncf %41 : vector<2x8x8xf32> to vector<2x8x8xbf16>
    "tpu.trace_start"() <{level = 10 : i32, message = "bqk,bkd->bqd"}> : () -> ()
    %cst_17 = arith.constant dense<0.000000e+00> : vector<2x8x8xf32>
    %43 = tpu.matmul %42, %25, %cst_17 {dimension_numbers = #tpu.dot_dimension_numbers<[2], [1], [1], [2], [0, 0, 0, 1, 1, 2], [0], [0]>} : vector<2x8x8xbf16>, vector<2x8x8xbf16>, vector<2x8x8xf32> -> vector<2x8x8xf32>
    "tpu.trace_stop"() : () -> ()
    %44 = vector.shape_cast %43 : vector<2x8x8xf32> to vector<16x8xf32>
    %45 = arith.truncf %44 : vector<16x8xf32> to vector<16x8xbf16>
    %c0_18 = arith.constant 0 : index
    %c0_19 = arith.constant 0 : index
    %46 = vector.load %arg12[%c0_18, %c0_19] : memref<16x32xbf16, #tpu.memory_space<vmem>>, vector<16x8xbf16>
    tpu.vector_store %arg12[%c0_18, %c0_19], %45 {strides = array<i32>} : memref<16x32xbf16, #tpu.memory_space<vmem>>, vector<16x8xbf16>,
    %47 = vector.extract_strided_slice %23 {offsets = [0, 0, 8], sizes = [2, 8, 8], strides = [1, 1, 1]} : vector<2x8x64xbf16> to vector<2x8x8xbf16>
    "tpu.trace_start"() <{level = 10 : i32, message = "bqd,bkd->bqk"}> : () -> ()
    %cst_20 = arith.constant dense<0.000000e+00> : vector<2x8x8xf32>
    %48 = tpu.matmul %47, %24, %cst_20 {dimension_numbers = #tpu.dot_dimension_numbers<[2], [2], [1], [1], [0, 0, 0, 1, 1, 1], [0], [0]>} : vector<2x8x8xbf16>, vector<2x8x8xbf16>, vector<2x8x8xf32> -> vector<2x8x8xf32>
    "tpu.trace_stop"() : () -> ()
    %c1 = arith.constant 1 : index
    %c0_21 = arith.constant 0 : index
    %c0_22 = arith.constant 0 : index
    %49 = vector.load %arg2[%c1, %c0_21, %c0_22] : memref<4x8x8xf32, #tpu.memory_space<vmem>>, vector<1x8x8xf32>
    %50 = vector.shape_cast %49 : vector<1x8x8xf32> to vector<8x8xf32>
    %51 = vector.shape_cast %50 : vector<8x8xf32> to vector<1x8x8xf32>
    %52 = vector.broadcast %51 : vector<1x8x8xf32> to vector<2x8x8xf32>
    %53 = arith.addf %48, %52 : vector<2x8x8xf32>
    %cst_23 = arith.constant dense<0xFF800000> : vector<2x8xf32>
    %54 = vector.multi_reduction <maximumf>, %53, %cst_23 [2] : vector<2x8x8xf32> to vector<2x8xf32>
    %55 = vector.shape_cast %54 : vector<2x8xf32> to vector<2x8x1xf32>
    %56 = vector.broadcast %55 : vector<2x8x1xf32> to vector<2x8x8xf32>
    %57 = arith.subf %53, %56 : vector<2x8x8xf32>
    %58 = math.exp %57 : vector<2x8x8xf32>
    %cst_24 = arith.constant dense<0.000000e+00> : vector<2x8xf32>
    %59 = vector.multi_reduction <add>, %58, %cst_24 [2] : vector<2x8x8xf32> to vector<2x8xf32>
    %60 = vector.shape_cast %59 : vector<2x8xf32> to vector<2x8x1xf32>
    %61 = vector.broadcast %60 : vector<2x8x1xf32> to vector<2x8x8xf32>
    %62 = arith.divf %58, %61 : vector<2x8x8xf32>
    %63 = arith.truncf %62 : vector<2x8x8xf32> to vector<2x8x8xbf16>
    "tpu.trace_start"() <{level = 10 : i32, message = "bqk,bkd->bqd"}> : () -> ()
    %cst_25 = arith.constant dense<0.000000e+00> : vector<2x8x8xf32>
    %64 = tpu.matmul %63, %25, %cst_25 {dimension_numbers = #tpu.dot_dimension_numbers<[2], [1], [1], [2], [0, 0, 0, 1, 1, 2], [0], [0]>} : vector<2x8x8xbf16>, vector<2x8x8xbf16>, vector<2x8x8xf32> -> vector<2x8x8xf32>
    "tpu.trace_stop"() : () -> ()
    %65 = vector.shape_cast %64 : vector<2x8x8xf32> to vector<16x8xf32>
    %66 = arith.truncf %65 : vector<16x8xf32> to vector<16x8xbf16>
    %c0_26 = arith.constant 0 : index
    %c8 = arith.constant 8 : index
    %67 = vector.load %arg12[%c0_26, %c8] : memref<16x32xbf16, #tpu.memory_space<vmem>>, vector<16x8xbf16>
    tpu.vector_store %arg12[%c0_26, %c8], %66 {strides = array<i32>} : memref<16x32xbf16, #tpu.memory_space<vmem>>, vector<16x8xbf16>,
    %68 = vector.extract_strided_slice %23 {offsets = [0, 0, 40], sizes = [2, 8, 8], strides = [1, 1, 1]} : vector<2x8x64xbf16> to vector<2x8x8xbf16>
    %69 = vector.extract_strided_slice %23 {offsets = [0, 0, 56], sizes = [2, 8, 8], strides = [1, 1, 1]} : vector<2x8x64xbf16> to vector<2x8x8xbf16>
    %70 = vector.extract_strided_slice %23 {offsets = [0, 0, 16], sizes = [2, 8, 8], strides = [1, 1, 1]} : vector<2x8x64xbf16> to vector<2x8x8xbf16>
    "tpu.trace_start"() <{level = 10 : i32, message = "bqd,bkd->bqk"}> : () -> ()
    %cst_27 = arith.constant dense<0.000000e+00> : vector<2x8x8xf32>
    %71 = tpu.matmul %70, %68, %cst_27 {dimension_numbers = #tpu.dot_dimension_numbers<[2], [2], [1], [1], [0, 0, 0, 1, 1, 1], [0], [0]>} : vector<2x8x8xbf16>, vector<2x8x8xbf16>, vector<2x8x8xf32> -> vector<2x8x8xf32>
    "tpu.trace_stop"() : () -> ()
    %c2 = arith.constant 2 : index
    %c0_28 = arith.constant 0 : index
    %c0_29 = arith.constant 0 : index
    %72 = vector.load %arg2[%c2, %c0_28, %c0_29] : memref<4x8x8xf32, #tpu.memory_space<vmem>>, vector<1x8x8xf32>
    %73 = vector.shape_cast %72 : vector<1x8x8xf32> to vector<8x8xf32>
    %74 = vector.shape_cast %73 : vector<8x8xf32> to vector<1x8x8xf32>
    %75 = vector.broadcast %74 : vector<1x8x8xf32> to vector<2x8x8xf32>
    %76 = arith.addf %71, %75 : vector<2x8x8xf32>
    %cst_30 = arith.constant dense<0xFF800000> : vector<2x8xf32>
    %77 = vector.multi_reduction <maximumf>, %76, %cst_30 [2] : vector<2x8x8xf32> to vector<2x8xf32>
    %78 = vector.shape_cast %77 : vector<2x8xf32> to vector<2x8x1xf32>
    %79 = vector.broadcast %78 : vector<2x8x1xf32> to vector<2x8x8xf32>
    %80 = arith.subf %76, %79 : vector<2x8x8xf32>
    %81 = math.exp %80 : vector<2x8x8xf32>
    %cst_31 = arith.constant dense<0.000000e+00> : vector<2x8xf32>
    %82 = vector.multi_reduction <add>, %81, %cst_31 [2] : vector<2x8x8xf32> to vector<2x8xf32>
    %83 = vector.shape_cast %82 : vector<2x8xf32> to vector<2x8x1xf32>
    %84 = vector.broadcast %83 : vector<2x8x1xf32> to vector<2x8x8xf32>
    %85 = arith.divf %81, %84 : vector<2x8x8xf32>
    %86 = arith.truncf %85 : vector<2x8x8xf32> to vector<2x8x8xbf16>
    "tpu.trace_start"() <{level = 10 : i32, message = "bqk,bkd->bqd"}> : () -> ()
    %cst_32 = arith.constant dense<0.000000e+00> : vector<2x8x8xf32>
    %87 = tpu.matmul %86, %69, %cst_32 {dimension_numbers = #tpu.dot_dimension_numbers<[2], [1], [1], [2], [0, 0, 0, 1, 1, 2], [0], [0]>} : vector<2x8x8xbf16>, vector<2x8x8xbf16>, vector<2x8x8xf32> -> vector<2x8x8xf32>
    "tpu.trace_stop"() : () -> ()
    %88 = vector.shape_cast %87 : vector<2x8x8xf32> to vector<16x8xf32>
    %89 = arith.truncf %88 : vector<16x8xf32> to vector<16x8xbf16>
    %c0_33 = arith.constant 0 : index
    %c16 = arith.constant 16 : index
    %90 = vector.load %arg12[%c0_33, %c16] : memref<16x32xbf16, #tpu.memory_space<vmem>>, vector<16x8xbf16>
    tpu.vector_store %arg12[%c0_33, %c16], %89 {strides = array<i32>} : memref<16x32xbf16, #tpu.memory_space<vmem>>, vector<16x8xbf16>,
    %91 = vector.extract_strided_slice %23 {offsets = [0, 0, 24], sizes = [2, 8, 8], strides = [1, 1, 1]} : vector<2x8x64xbf16> to vector<2x8x8xbf16>
    "tpu.trace_start"() <{level = 10 : i32, message = "bqd,bkd->bqk"}> : () -> ()
    %cst_34 = arith.constant dense<0.000000e+00> : vector<2x8x8xf32>
    %92 = tpu.matmul %91, %68, %cst_34 {dimension_numbers = #tpu.dot_dimension_numbers<[2], [2], [1], [1], [0, 0, 0, 1, 1, 1], [0], [0]>} : vector<2x8x8xbf16>, vector<2x8x8xbf16>, vector<2x8x8xf32> -> vector<2x8x8xf32>
    "tpu.trace_stop"() : () -> ()
    %c3 = arith.constant 3 : index
    %c0_35 = arith.constant 0 : index
    %c0_36 = arith.constant 0 : index
    %93 = vector.load %arg2[%c3, %c0_35, %c0_36] : memref<4x8x8xf32, #tpu.memory_space<vmem>>, vector<1x8x8xf32>
    %94 = vector.shape_cast %93 : vector<1x8x8xf32> to vector<8x8xf32>
    %95 = vector.shape_cast %94 : vector<8x8xf32> to vector<1x8x8xf32>
    %96 = vector.broadcast %95 : vector<1x8x8xf32> to vector<2x8x8xf32>
    %97 = arith.addf %92, %96 : vector<2x8x8xf32>
    %cst_37 = arith.constant dense<0xFF800000> : vector<2x8xf32>
    %98 = vector.multi_reduction <maximumf>, %97, %cst_37 [2] : vector<2x8x8xf32> to vector<2x8xf32>
    %99 = vector.shape_cast %98 : vector<2x8xf32> to vector<2x8x1xf32>
    %100 = vector.broadcast %99 : vector<2x8x1xf32> to vector<2x8x8xf32>
    %101 = arith.subf %97, %100 : vector<2x8x8xf32>
    %102 = math.exp %101 : vector<2x8x8xf32>
    %cst_38 = arith.constant dense<0.000000e+00> : vector<2x8xf32>
    %103 = vector.multi_reduction <add>, %102, %cst_38 [2] : vector<2x8x8xf32> to vector<2x8xf32>
    %104 = vector.shape_cast %103 : vector<2x8xf32> to vector<2x8x1xf32>
    %105 = vector.broadcast %104 : vector<2x8x1xf32> to vector<2x8x8xf32>
    %106 = arith.divf %102, %105 : vector<2x8x8xf32>
    %107 = arith.truncf %106 : vector<2x8x8xf32> to vector<2x8x8xbf16>
    "tpu.trace_start"() <{level = 10 : i32, message = "bqk,bkd->bqd"}> : () -> ()
    %cst_39 = arith.constant dense<0.000000e+00> : vector<2x8x8xf32>
    %108 = tpu.matmul %107, %69, %cst_39 {dimension_numbers = #tpu.dot_dimension_numbers<[2], [1], [1], [2], [0, 0, 0, 1, 1, 2], [0], [0]>} : vector<2x8x8xbf16>, vector<2x8x8xbf16>, vector<2x8x8xf32> -> vector<2x8x8xf32>
    "tpu.trace_stop"() : () -> ()
    %109 = vector.shape_cast %108 : vector<2x8x8xf32> to vector<16x8xf32>
    %110 = arith.truncf %109 : vector<16x8xf32> to vector<16x8xbf16>
    %c0_40 = arith.constant 0 : index
    %c24 = arith.constant 24 : index
    %111 = vector.load %arg12[%c0_40, %c24] : memref<16x32xbf16, #tpu.memory_space<vmem>>, vector<16x8xbf16>
    tpu.vector_store %arg12[%c0_40, %c24], %110 {strides = array<i32>} : memref<16x32xbf16, #tpu.memory_space<vmem>>, vector<16x8xbf16>,
    %c0_41 = arith.constant 0 : index
    %c0_42 = arith.constant 0 : index
    %112 = vector.load %arg12[%c0_41, %c0_42] : memref<16x32xbf16, #tpu.memory_space<vmem>>, vector<16x32xbf16>
    %c0_43 = arith.constant 0 : index
    %c0_44 = arith.constant 0 : index
    %c0_45 = arith.constant 0 : index
    %113 = vector.load %arg6[%c0_43, %c0_44, %c0_45] : memref<1x32x32xbf16, #tpu.memory_space<vmem>>, vector<1x32x32xbf16>
    %114 = vector.shape_cast %113 : vector<1x32x32xbf16> to vector<32x32xbf16>
    %cst_46 = arith.constant dense<0.000000e+00> : vector<16x32xf32>
    %115 = tpu.matmul %112, %114, %cst_46 {dimension_numbers = #tpu.dot_dimension_numbers<[1], [0], [0], [1], [0, 0, 1, 1], [], []>} : vector<16x32xbf16>, vector<32x32xbf16>, vector<16x32xf32> -> vector<16x32xf32>
    %116 = arith.addf %3, %115 : vector<16x32xf32>
    %c0_47 = arith.constant 0 : index
    %c0_48 = arith.constant 0 : index
    %c0_49 = arith.constant 0 : index
    %117 = vector.load %arg7[%c0_47, %c0_48, %c0_49] : memref<1x1x32xf32, #tpu.memory_space<vmem>>, vector<1x1x32xf32>
    %118 = vector.shape_cast %117 : vector<1x1x32xf32> to vector<1x32xf32>
    %119 = arith.mulf %116, %116 : vector<16x32xf32>
    %cst_50 = arith.constant dense<0.000000e+00> : vector<16xf32>
    %120 = vector.multi_reduction <add>, %119, %cst_50 [1] : vector<16x32xf32> to vector<16xf32>
    %121 = vector.shape_cast %120 : vector<16xf32> to vector<16x1xf32>
    %cst_51 = arith.constant 3.200000e+01 : f32
    %122 = vector.broadcast %cst_51 : f32 to vector<16x1xf32>
    %123 = arith.divf %121, %122 : vector<16x1xf32>
    %cst_52 = arith.constant 1.1920929E-7 : f32
    %124 = vector.broadcast %cst_52 : f32 to vector<16x1xf32>
    %125 = arith.addf %123, %124 : vector<16x1xf32>
    %126 = math.rsqrt %125 : vector<16x1xf32>
    %127 = vector.broadcast %126 : vector<16x1xf32> to vector<16x32xf32>
    %128 = arith.mulf %116, %127 : vector<16x32xf32>
    %129 = vector.broadcast %118 : vector<1x32xf32> to vector<16x32xf32>
    %130 = arith.mulf %128, %129 : vector<16x32xf32>
    %131 = arith.truncf %130 : vector<16x32xf32> to vector<16x32xbf16>
    %c0_53 = arith.constant 0 : index
    %c0_54 = arith.constant 0 : index
    %c0_55 = arith.constant 0 : index
    %132 = vector.load %arg8[%c0_53, %c0_54, %c0_55] : memref<1x32x64xbf16, #tpu.memory_space<vmem>>, vector<1x32x64xbf16>
    %133 = vector.shape_cast %132 : vector<1x32x64xbf16> to vector<32x64xbf16>
    %cst_56 = arith.constant dense<0.000000e+00> : vector<16x64xf32>
    %134 = tpu.matmul %131, %133, %cst_56 {dimension_numbers = #tpu.dot_dimension_numbers<[1], [0], [0], [1], [0, 0, 1, 1], [], []>} : vector<16x32xbf16>, vector<32x64xbf16>, vector<16x64xf32> -> vector<16x64xf32>
    %135 = vector.extract_strided_slice %134 {offsets = [0, 0], sizes = [16, 32], strides = [1, 1]} : vector<16x64xf32> to vector<16x32xf32>
    %136 = vector.extract_strided_slice %134 {offsets = [0, 32], sizes = [16, 32], strides = [1, 1]} : vector<16x64xf32> to vector<16x32xf32>
    %137 = arith.negf %136 : vector<16x32xf32>
    %138 = math.exp %137 : vector<16x32xf32>
    %cst_57 = arith.constant 1.000000e+00 : f32
    %139 = vector.broadcast %cst_57 : f32 to vector<16x32xf32>
    %140 = arith.addf %139, %138 : vector<16x32xf32>
    %141 = arith.divf %139, %140 : vector<16x32xf32>
    %142 = arith.mulf %136, %141 : vector<16x32xf32>
    %143 = arith.mulf %135, %142 : vector<16x32xf32>
    %144 = arith.truncf %143 : vector<16x32xf32> to vector<16x32xbf16>
    %c0_58 = arith.constant 0 : index
    %c0_59 = arith.constant 0 : index
    %c0_60 = arith.constant 0 : index
    %145 = vector.load %arg9[%c0_58, %c0_59, %c0_60] : memref<1x32x32xbf16, #tpu.memory_space<vmem>>, vector<1x32x32xbf16>
    %146 = vector.shape_cast %145 : vector<1x32x32xbf16> to vector<32x32xbf16>
    %cst_61 = arith.constant dense<0.000000e+00> : vector<16x32xf32>
    %147 = tpu.matmul %144, %146, %cst_61 {dimension_numbers = #tpu.dot_dimension_numbers<[1], [0], [0], [1], [0, 0, 1, 1], [], []>} : vector<16x32xbf16>, vector<32x32xbf16>, vector<16x32xf32> -> vector<16x32xf32>
    %148 = arith.addf %116, %147 : vector<16x32xf32>
    %c0_62 = arith.constant 0 : index
    %c0_63 = arith.constant 0 : index
    %149 = vector.load %arg11[%c0_62, %c0_63] : memref<16x32xf32, #tpu.memory_space<vmem>>, vector<16x32xf32>
    tpu.vector_store %arg11[%c0_62, %c0_63], %148 {strides = array<i32>} : memref<16x32xf32, #tpu.memory_space<vmem>>, vector<16x32xf32>,
    %c1_i32 = arith.constant 1 : i32
    %150 = arith.cmpi eq, %arg1, %c1_i32 : i32
    %151 = arith.extui %150 : i1 to i32
    %c0_i32_64 = arith.constant 0 : i32
    %152 = arith.cmpi ne, %151, %c0_i32_64 : i32
    scf.if %152 {
      %153 = vector.shape_cast %148 : vector<16x32xf32> to vector<2x8x32xf32>
      %c0_65 = arith.constant 0 : index
      %c0_66 = arith.constant 0 : index
      %c0_67 = arith.constant 0 : index
      %154 = vector.load %arg10[%c0_65, %c0_66, %c0_67] : memref<2x8x32xf32, #tpu.memory_space<vmem>>, vector<2x8x32xf32>
      tpu.vector_store %arg10[%c0_65, %c0_66, %c0_67], %153 {strides = array<i32>} : memref<2x8x32xf32, #tpu.memory_space<vmem>>, vector<2x8x32xf32>,
    } else {
    }
    return
  }
  func.func @transform_0(%arg0: i32, %arg1: i32) -> (i32, i32, i32) {
    %c0_i32 = arith.constant 0 : i32
    %c0_i32_0 = arith.constant 0 : i32
    %c0_i32_1 = arith.constant 0 : i32
    %c0_i32_2 = arith.constant 0 : i32
    return %c0_i32, %c0_i32_0, %c0_i32_1 : i32, i32, i32
  }
  func.func @transform_1(%arg0: i32, %arg1: i32) -> (i32, i32, i32) {
    %c0_i32 = arith.constant 0 : i32
    %c0_i32_0 = arith.constant 0 : i32
    %c0_i32_1 = arith.constant 0 : i32
    return %arg0, %c0_i32, %c0_i32_0 : i32, i32, i32
  }
  func.func @transform_2(%arg0: i32, %arg1: i32) -> (i32, i32, i32) {
    %c0_i32 = arith.constant 0 : i32
    %c0_i32_0 = arith.constant 0 : i32
    %c0_i32_1 = arith.constant 0 : i32
    return %arg1, %c0_i32, %c0_i32_0 : i32, i32, i32
  }
  func.func @transform_3(%arg0: i32, %arg1: i32) -> (i32, i32, i32) {
    %c0_i32 = arith.constant 0 : i32
    %c0_i32_0 = arith.constant 0 : i32
    %c0_i32_1 = arith.constant 0 : i32
    return %arg1, %c0_i32, %c0_i32_0 : i32, i32, i32
  }
  func.func @transform_4(%arg0: i32, %arg1: i32) -> (i32, i32, i32) {
    %c0_i32 = arith.constant 0 : i32
    %c0_i32_0 = arith.constant 0 : i32
    %c0_i32_1 = arith.constant 0 : i32
    return %arg1, %c0_i32, %c0_i32_0 : i32, i32, i32
  }
  func.func @transform_5(%arg0: i32, %arg1: i32) -> (i32, i32, i32) {
    %c0_i32 = arith.constant 0 : i32
    %c0_i32_0 = arith.constant 0 : i32
    %c0_i32_1 = arith.constant 0 : i32
    return %arg1, %c0_i32, %c0_i32_0 : i32, i32, i32
  }
  func.func @transform_6(%arg0: i32, %arg1: i32) -> (i32, i32, i32) {
    %c0_i32 = arith.constant 0 : i32
    %c0_i32_0 = arith.constant 0 : i32
    %c0_i32_1 = arith.constant 0 : i32
    return %arg1, %c0_i32, %c0_i32_0 : i32, i32, i32
  }
  func.func @transform_7(%arg0: i32, %arg1: i32) -> (i32, i32, i32) {
    %c0_i32 = arith.constant 0 : i32
    %c0_i32_0 = arith.constant 0 : i32
    %c0_i32_1 = arith.constant 0 : i32
    return %arg1, %c0_i32, %c0_i32_0 : i32, i32, i32
  }
  func.func @transform_8(%arg0: i32, %arg1: i32) -> (i32, i32, i32) {
    %c0_i32 = arith.constant 0 : i32
    %c0_i32_0 = arith.constant 0 : i32
    %c0_i32_1 = arith.constant 0 : i32
    return %arg0, %c0_i32, %c0_i32_0 : i32, i32, i32
  }
}

</mosaic_0001>

<bundles_post_ra>
// kernel: tpu_custom_call.1
= control target key start
LH: loop header
LB: loop body
LE: loop exit
PB: predicated region body
PF: predicated region fallthrough
CT: control target
= control target key end

     0   :  { %s2603_s0 = inlined_call_operand.hbm [shape: f32[4,8,8], index: 0, kind: input, shape index: {}]   ;;  %s2604_s1 = inlined_call_operand.hbm [shape: f32[2,8,32], index: 1, kind: input, shape index: {}]   ;;  %s2605_s2 = inlined_call_operand.hbm [shape: f32[2,1,32], index: 2, kind: input, shape index: {}]   ;;  %s2606_s3 = inlined_call_operand.hbm [shape: bf16[2,32,64], index: 3, kind: input, shape index: {}]   ;;  %s2607_s4 = inlined_call_operand.hbm [shape: bf16[2,32,32], index: 4, kind: input, shape index: {}]   ;;  %s2608_s5 = inlined_call_operand.vmem [shape: f32[2,1,32], index: 5, kind: input, shape index: {}]   ;;  %s2609_s6 = inlined_call_operand.hbm [shape: bf16[2,32,64], index: 6, kind: input, shape index: {}]   ;;  %s2610_s7 = inlined_call_operand.hbm [shape: bf16[2,32,32], index: 7, kind: input, shape index: {}]   ;;  %s2611_s8 = inlined_call_operand.hbm [shape: f32[2,8,32], index: 8, kind: output, shape index: {}]  }
   0x1   :  { %2616 = sst [smem:[#allocation21_spill]] %s2603_s0 }
   0x2   :  { %2617 = sst [smem:[#allocation22_spill]] %s2604_s1 }
   0x3   :  { %2618 = sst [smem:[#allocation23_spill]] %s2605_s2 }
   0x4   :  { %2619 = sst [smem:[#allocation24_spill]] %s2606_s3 }
   0x5   :  { %2620 = sst [smem:[#allocation25_spill]] %s2607_s4 }
   0x6   :  { %2621 = sst [smem:[#allocation26_spill]] %s2609_s6 }
   0x7   :  { %13 = vsyncpa [#allocation5], 0 }
   0x8   :  { %14 = vsyncpa [#allocation8], 0 }
   0x9   :  { %15 = vsyncpa [#allocation6], 0  ;;  %s2227_s27 = smov 0   ;;  %s2229_s28 = smov 0  }
   0xa   :  { %s2231_s29 = smov 0   ;;  %s2233_s30 = smov 0  }
   0xb   :  { %s2235_s9 = smov 0   ;;  %s2237_s10 = smov 0  }
   0xc LB: > { %2622 = sst [smem:[#allocation19_spill]] %s2157_s9  ;;  %s2256_s11 = sadd.s32 4294967295, %s2161_s10   ;;  %s2161_s10 = sphi %s2237_s10, %s21_s10   ;;  %s2157_s9 = sphi %s2235_s9, %s2638_s9   ;;  %s2153_s30 = sphi %s2233_s30, %s2637_s30   ;;  %s2149_s29 = sphi %s2231_s29, %s2641_s29   ;;  %s2145_s28 = sphi %s2229_s28, %s2640_s28   ;;  %s2141_s27 = sphi %s2227_s27, %s2639_s27  }
   0xd   : > { %p100_p0 = scmp.ne.s32.totalorder %s2145_s28, %s2141_s27  ;;  %p101_p1 = scmp.eq.s32.totalorder %s2256_s11, 0 }
   0xe   : > { %p1590_p2 = scmp.ge.s32.totalorder %s2161_s10, 1  ;;  %p267_p3 = scmp.lt.s32.totalorder %s2161_s10, 3 }
   0xf   : > { %p2264_p4 = por %p101_p1, %p100_p0  ;;  %s2624_s0 = sld [smem:[#allocation21_spill]] }
  0x10   : > { %p2271_p5 = pnand %p1590_p2, %p267_p3  ;;  %s2163_s17 = smov [#allocation4]  }
  0x11   : > { %s280_s18 = sshll.u32 %s2163_s17, 4  ;;  %s2612_s20 = smov 128   ;;  %s281_s18 = int_to_ptr.vmem [resolvable:$true] %s280_s18 }
  0x12   : > { %p1712_p6 = pneg %p2271_p5  ;;  %s2613_s21 = smov 8  }
  0x13   : > { %s30_s22 = sadd.s32 1, %s2157_s9  ;;  %s87_s23 = sadd.s32 1, %s2149_s29 }
  0x14   : > { %p2279_p7 = pnand %p1712_p6, %p101_p1  ;;  %p31_p8 = scmp.ge.s32.totalorder %s30_s22, 2 }
  0x15   : > { %s278_s15 = sshll.u32 %s2624_s0, 4  ;;  %p94_p9 = scmp.ne.s32.totalorder %s2149_s29, %s2145_s28  ;;  %s279_s15 = int_to_ptr.hbm [resolvable:$true] %s278_s15 }
  0x16   : > { %1715 = dma.hbm_to_vmem [thread:$0]  (!%p2279_p7), %s279_s15, 512, %s281_s18, [#allocation5], %s2612_s20, %s2612_s20, %s2613_s21  }
  0x17   : > { %p95_p10 = scmp.eq.s32.totalorder %s2161_s10, 0  ;;  %s2643_s22 = smov (%p31_p8, %s30_s22), 0 }
  0x18   : > { %2627 = sst [smem:[#allocation20_spill]] %s2643_s22  ;;  %p1737_p12 = scmp.lt.s32.totalorder %s2161_s10, 2 }
  0x19   : > { %p2295_p11 = por %p95_p10, %p94_p9  ;;  %s84_s25 = ssub.s32 %s2157_s9, %s2643_s22 }
  0x1a   : > { %s311_s26 = sand.u32 1, %s2161_s10   ;;  %p85_p13 = scmp.eq.s32.totalorder %s84_s25, 0 }
  0x1b   : > { %s313_s27 = sand.u32 1, %s2149_s29   ;;  %s2629_s2 = sld [smem:[#allocation23_spill]] }
  0x1c   : > { %s2309_s17 = scalar_select %p85_p13, %s2149_s29, %s87_s23  }
  0x1d   : > { %s314_s20 = scalar_lea.vmem [#allocation9], %s313_s27  ;;  %p2313_p0 = pnand %p1737_p12, %p2295_p11 }
  0x1e   : > { %s321_s21 = sshll.u32 %s314_s20, 4  ;;  %s2317_s25 = sshll.u32 %s313_s27, 4  ;;  %s322_s21 = int_to_ptr.vmem [resolvable:$true] %s321_s21 }
  0x1f   : > { %s2320_s13 = sshll.u32 %s2157_s9, 4  ;;  %s2322_s23 = scalar_lea.sflag [#allocation5], %s311_s26 }
  0x20   : > { %s2631_s3 = sld [smem:[#allocation24_spill]]  ;;  %s332_s27 = scalar_lea.vmem [#allocation10], %s2317_s25 }
  0x21   : > { %s317_s15 = scalar_lea.hbm %s2629_s2, %s2157_s9  ;;  %s2166_s22 = smov 64  }
  0x22   : > { %s319_s18 = sshll.u32 %s317_s15, 4  ;;  %s340_s15 = sshll.u32 %s332_s27, 4  ;;  %s320_s18 = int_to_ptr.hbm [resolvable:$true] %s319_s18  ;;  %s341_s15 = int_to_ptr.vmem [resolvable:$true] %s340_s15 }
  0x23   : > { %1722 = dma.hbm_to_vmem [thread:$0]  (!%p2313_p0), %s320_s18, 16, %s322_s21, %s2322_s23  }
  0x24   : > { %s2167_s26 = smov 4   ;;  %s2632_s4 = sld [smem:[#allocation25_spill]] }
  0x25   : > { %s354_s24 = scalar_lea.vmem [#allocation11], %s2317_s25  ;;  %s2633_s6 = sld [smem:[#allocation26_spill]] }
  0x26   : > { %s337_s14 = scalar_lea.hbm %s2631_s3, %s2320_s13  ;;  %s362_s3 = sshll.u32 %s354_s24, 4  ;;  %s363_s3 = int_to_ptr.vmem [resolvable:$true] %s362_s3 }
  0x27   : > { %s338_s2 = sshll.u32 %s337_s14, 4  ;;  %s2634_s1 = sld [smem:[#allocation22_spill]]  ;;  %s339_s2 = int_to_ptr.hbm [resolvable:$true] %s338_s2 }
  0x28   : > { %1725 = dma.hbm_to_vmem [thread:$0]  (!%p2313_p0), %s339_s2, 256, %s341_s15, %s2322_s23, %s2166_s22, %s2166_s22, %s2167_s26  }
  0x29   : > { %s382_s15 = scalar_lea.vmem [#allocation12], %s2317_s25  ;;  %s404_s24 = scalar_lea.vmem [#allocation13], %s2317_s25 }
  0x2a   : > { %s359_s20 = scalar_lea.hbm %s2632_s4, %s2320_s13  ;;  %s390_s21 = sshll.u32 %s382_s15, 4  ;;  %s391_s21 = int_to_ptr.vmem [resolvable:$true] %s390_s21 }
  0x2b   : > { %s360_s9 = sshll.u32 %s359_s20, 4  ;;  %s387_s2 = scalar_lea.hbm %s2633_s6, %s2320_s13  ;;  %s361_s9 = int_to_ptr.hbm [resolvable:$true] %s360_s9 }
  0x2c   : > { %1728 = dma.hbm_to_vmem [thread:$0]  (!%p2313_p0), %s361_s9, 256, %s363_s3, %s2322_s23, %s2166_s22, %s2166_s22, %s2167_s26  }
  0x2d   : > { %s388_s18 = sshll.u32 %s387_s2, 4  ;;  %s295_s4 = sshll.u32 %s2634_s1, 4  ;;  %s389_s18 = int_to_ptr.hbm [resolvable:$true] %s388_s18  ;;  %s296_s4 = int_to_ptr.hbm [resolvable:$true] %s295_s4 }
  0x2e   : > { %1731 = dma.hbm_to_vmem [thread:$0]  (!%p2313_p0), %s389_s18, 256, %s391_s21, %s2322_s23, %s2166_s22, %s2166_s22, %s2167_s26  }
  0x2f   : > { %s2168_s3 = smov [#allocation7]   ;;  %s409_s2 = scalar_lea.hbm %s2610_s7, %s2320_s13 }
  0x30   : > { %s297_s9 = sshll.u32 %s2168_s3, 4  ;;  %s2635_s15 = smov 8   ;;  %s298_s9 = int_to_ptr.vmem [resolvable:$true] %s297_s9 }
  0x31   : > { %s2636_s6 = smov 128   ;;  %s410_s20 = sshll.u32 %s409_s2, 4  ;;  %s411_s20 = int_to_ptr.hbm [resolvable:$true] %s410_s20 }
  0x32   : > { %1718 = dma.hbm_to_vmem [thread:$0]  (!%p2279_p7), %s296_s4, 256, %s298_s9, [#allocation8], %s2636_s6, %s2636_s6, %s2635_s15  }
  0x33   : > { %s412_s1 = sshll.u32 %s404_s24, 4  ;;  %424 = sbr.rel (%p2271_p5) target bundleno = 1917 (0x77d), region = 52  ;;  %s413_s1 = int_to_ptr.vmem [resolvable:$true] %s412_s1 }
  0x34   : > { %1734 = dma.hbm_to_vmem [thread:$0]  (!%p2313_p0), %s411_s20, 256, %s413_s1, %s2322_s23, %s2166_s22, %s2166_s22, %s2167_s26  }
  0x38   : > { %2124 = dma.done.wait (%p101_p1), [#allocation5], 512  }
  0x39   : > { %2126 = vsyncadd (%p101_p1), [#allocation5], 4294966784 }
  0x3a   : > { %2128 = dma.done.wait (%p101_p1), [#allocation8], 256  }
  0x3b   : > { %2130 = vsyncadd (%p101_p1), [#allocation8], 4294967040  ;;  %s436_s0 = sand.u32 1, %s2256_s11   ;;  %s438_s1 = sand.u32 1, %s2145_s28  }
  0x3c   : > { %s437_s4 = scalar_lea.sflag [#allocation5], %s436_s0  ;;  %s2391_s6 = scalar_lea.vmem [#allocation9], %s438_s1 }
  0x3d   : > { %2132 = dma.done.wait (%p2264_p4), %s437_s4, 1040  }
  0x3e   : > { %2134 = vsyncadd (%p2264_p4), %s437_s4, 4294966256  ;;  %s2397_s16 = sshll.u32 %s438_s1, 4  ;;  %p531_p1 = scmp.lt.s32.totalorder %s2153_s30, 1 }
  0x3f   : > { %s449_s23 = scalar_lea.vmem [#allocation10], %s2397_s16  ;;  %s459_s26 = scalar_lea.vmem [#allocation11], %s2397_s16 }
  0x40   : > { %s2401_s19 = scalar_select %p531_p1, %s2153_s30, 1 }
  0x41   : > { %s469_s12 = scalar_lea.vmem [#allocation12], %s2397_s16  ;;  %s479_s21 = scalar_lea.vmem [#allocation13], %s2397_s16 }
  0x42   : > { %s533_s13 = scalar_lea.vmem %s2608_s5, %s2401_s19  ;;  %p1613_p2 = scmp.ne.s32.totalorder %s2153_s30, 0 }
  0x44   : > { %539 = sbr.rel (%p1613_p2) target bundleno = 76 (0x4c), region = 84 }
  0x49   : > { %v540_v0 = vld [vmem:[#allocation7] sm:$0xff]  ;;  %vm542_vm0 = vcmask 261120   ;;  %v541_v1 = vld [vmem:[#allocation7 + $0x8] sm:$0xff] }
  0x4a   : > { %543 = vst.msk [vmem:[#allocation2] sm:$0xff] %vm542_vm0, %v540_v0 }
  0x4b   : > { %544 = vst.msk [vmem:[#allocation2 + $0x8] sm:$0xff] %vm542_vm0, %v541_v1 }
  0x4c PF: > { %vm550_vm1 = vcmask 261120   ;;  %v2169_v8 = vmov 32.0   ;;  %v1682_v14 = vld [vmem:[%s449_s23 + $0x8] sm:$0xff]  ;;  %v1681_v16 = vld [vmem:[%s449_s23] sm:$0xff]  ;;  %s2170_s18 = smov 88   ;;  %s2171_s3 = smov 120  }
  0x4d   : > { %1811 = vrcp.f32 %v2169_v8  ;;  %621 = vmatpush.bf16.msra.mxu0 %v1682_v14  ;;  %v1809_v37 = vld [vmem:[%s2391_s6] ss:$0 sm:$0xff]  ;;  %s2172_s9 = smov 96   ;;  %s2173_s14 = smov 112   ;;  %vm637_vm9 = vcmask 64512   ;;  %v631_v1 = vld [vmem:[#allocation4] sm:$0xff] }
  0x4e   : > { %s2174_s27 = smov 104   ;;  %s2175_s2 = smov 80   ;;  %vm736_vm10 = vcmask 1043456  }
  0x4f   : > { %s2176_s15 = smov 72   ;;  %s2177_s20 = smov 8  }
  0x50   : > { %s2178_s24 = smov 16   ;;  %s2179_s0 = smov 24  }
  0x51   : > { %v2412_v2 = vld [vmem:[#allocation2] sm:$0xff]  ;;  %622 = vmatpush.bf16.msra.mxu0 %v1681_v16  ;;  %p1672_p3 = scmp.ne.s32.totalorder %s2153_s30, 1 }
  0x52   : > { %v548_v3 = vmul.f32 %v2412_v2, %v2412_v2  ;;  %v2416_v4 = vld [vmem:[#allocation2 + $0x8] sm:$0xff] }
  0x53   : > { %v549_v6 = vmul.f32 %v2416_v4, %v2416_v4  ;;  %v1812_v9 = vpop.eup %1811 }
  0x54   : > { %v551_v5 = vsel %vm550_vm1, %v548_v3, 0.0  ;;  %v558_v10 = vmul.f32 32.0, %v1812_v9  ;;  %vm562_vm2 = vweird.f32 %v1812_v9  ;;  %v780_v3 = vld [vmem:[#allocation4 + $0x8] sm:$0xff] }
  0x55   : > { %552 = vadd.xlane.f32.xlu0 %v551_v5  ;;  %v554_v7 = vsel %vm550_vm1, %v549_v6, 0.0 }
  0x56   : > { %v559_v11 = vsub.f32 1.0, %v558_v10 }
  0x58   : > { %v560_v12 = vmul.f32 %v1812_v9, %v559_v11 }
  0x5a   : > { %v561_v13 = vadd.f32 %v1812_v9, %v560_v12 }
  0x5c   : > { %v2424_v15 = vsel %vm562_vm2, %v1812_v9, %v561_v13 }
  0x5d   : > { %555 = vadd.xlane.f32.xlu0 %v554_v7 }
  0xc8   : > { %v553_v17 = vpop.xlane.xlu0 %552 }
  0xc9   : > { %v564_v18 = vmul.f32 %v2424_v15, %v553_v17 }
  0xcb   : > { %v566_v19 = vadd.f32 1.1920929e-07, %v564_v18 }
  0xcd   : > { %1813 = vrsqrt.f32 %v566_v19  ;;  %vm574_vm4 = vweird.f32 %v566_v19 }
  0xd0   : > { %v556_v20 = vpop.xlane.xlu0 %555 }
  0xd1   : > { %v565_v21 = vmul.f32 %v2424_v15, %v556_v20  ;;  %v913_v20 = vld [vmem:[#allocation4 + $0x10] sm:$0xff] }
  0xd3   : > { %v1814_v22 = vpop.eup %1813  ;;  %v567_v23 = vadd.f32 1.1920929e-07, %v565_v21 }
  0xd4   : > { %v569_v24 = vmul.f32 %v1814_v22, %v566_v19  ;;  %vm575_vm3 = vweird.f32 %v1814_v22 }
  0xd5   : > { %1815 = vrsqrt.f32 %v567_v23  ;;  %vm576_vm5 = vmor %vm574_vm4, %vm575_vm3  ;;  %vm584_vm7 = vweird.f32 %v567_v23 }
  0xd6   : > { %v570_v25 = vmul.f32 %v1814_v22, %v569_v24 }
  0xd8   : > { %v571_v26 = vmul.f32 0.5, %v570_v25 }
  0xda   : > { %v572_v27 = vsub.f32 1.5, %v571_v26 }
  0xdb   : > { %v1816_v28 = vpop.eup %1815 }
  0xdc   : > { %v579_v29 = vmul.f32 %v1816_v28, %v567_v23  ;;  %v573_v30 = vmul.f32 %v1814_v22, %v572_v27  ;;  %vm585_vm6 = vweird.f32 %v1816_v28  ;;  %v1066_v27 = vld [vmem:[#allocation4 + $0x18] sm:$0xff] }
  0xdd   : > { %vm586_vm8 = vmor %vm584_vm7, %vm585_vm6 }
  0xde   : > { %v580_v31 = vmul.f32 %v1816_v28, %v579_v29  ;;  %v577_v33 = vsel %vm576_vm5, %v1814_v22, %v573_v30 }
  0xdf   : > { %v588_v36 = vmul.f32 %v577_v33, %v2412_v2 }
  0xe0   : > { %v581_v32 = vmul.f32 0.5, %v580_v31 }
  0xe1   : > { %v593_v40 = vmul.f32 %v1809_v37, %v588_v36 }
  0xe2   : > { %v582_v34 = vsub.f32 1.5, %v581_v32 }
  0xe4   : > { %v583_v35 = vmul.f32 %v1816_v28, %v582_v34 }
  0xe6   : > { %v587_v38 = vsel %vm586_vm8, %v1816_v28, %v583_v35 }
  0xe7   : > { %v589_v39 = vmul.f32 %v587_v38, %v2416_v4 }
  0xe9   : > { %v594_v41 = vmul.f32 %v1809_v37, %v589_v39 }
  0xeb   : > { %v595_v42 = vpack.c.bf16 %v594_v41, %v593_v40 }
  0xed   : > { %1622 = vmatmul.msk.bf16.vlgmr.msra.gmra.mxu0 %vm550_vm1, %v595_v42 }
 0x16a   : > { %v624_v43 = vpop.f32.mrf.mxu0 }
 0x16b   : > { %v629_v44 = vpack.c.bf16 %v624_v43, %v624_v43 }
 0x16d   : > { %v633_v45 = vunpack.c.l.b16 %v629_v44 }
 0x16f   : > { %v2434_v46 = vpack.c.b16 %v633_v45, %v633_v45 }
 0x171   : > { %916 = vrot.lane.b32.xlu0 %v2434_v46, %s2170_s18  ;;  %781 = vrot.lane.b32.xlu2 %v2434_v46, %s2171_s3 }
 0x172   : > { %635 = vrot.lane.b32.xlu1 %v2434_v46, %s2172_s9  ;;  %v626_v47 = vpop.f32.mrf.mxu0 }
 0x173   : > { %v630_v48 = vpack.c.bf16 %v626_v47, %v626_v47 }
 0x175   : > { %v658_v49 = vunpack.c.l.b16 %v630_v48 }
 0x177   : > { %v2440_v50 = vpack.c.b16 %v658_v49, %v658_v49 }
 0x179   : > { %799 = vrot.lane.b32.xlu2 %v2440_v50, %s2171_s3 }
 0x17a   : > { %660 = vrot.lane.b32.xlu1 %v2440_v50, %s2172_s9 }
 0x181   : > { %914 = vrot.lane.b32.xlu2 %v2434_v46, %s2173_s14 }
 0x182   : > { %939 = vrot.lane.b32.xlu1 %v2440_v50, %s2170_s18 }
 0x189   : > { %1067 = vrot.lane.b32.xlu2 %v2434_v46, %s2174_s27 }
 0x18a   : > { %937 = vrot.lane.b32.xlu1 %v2440_v50, %s2173_s14 }
 0x192   : > { %1085 = vrot.lane.b32.xlu1 %v2440_v50, %s2174_s27 }
 0x1cb   : > { %v782_v55 = vpop.permute.xlu2 %781 }
 0x1d3   : > { %v800_v58 = vpop.permute.xlu2 %799 }
 0x1db   : > { %v915_v61 = vpop.permute.xlu2 %914 }
 0x1e3   : > { %v917_v51 = vpop.permute.xlu0 %916  ;;  %v1068_v62 = vpop.permute.xlu2 %1067 }
 0x1e4   : > { %v922_v52 = vsel %vm637_vm9, %v917_v51, 0  ;;  %v636_v53 = vpop.permute.xlu1 %635 }
 0x1e5   : > { %v642_v54 = vsel %vm637_vm9, %v636_v53, 0 }
 0x1e6   : > { %651 = vmatpush.bf16.xpose.msra.mxu1 %v642_v54  ;;  %793 = vmatpush.bf16.xpose.msrb.mxu0 %v642_v54 }
 0x1ec   : > { %v661_v56 = vpop.permute.xlu1 %660 }
 0x1ed   : > { %1623 = vmatmul.msk.bf16.vlgmr.msra.gmra.mxu1 %vm637_vm9, %v629_v44  ;;  %1627 = vmatmul.msk.bf16.vlgmr.msrb.gmra.mxu0 %vm637_vm9, %v782_v55  ;;  %v666_v57 = vsel %vm637_vm9, %v661_v56, 0 }
 0x1ee   : > { %931 = vmatpush.bf16.xpose.msra.mxu0 %v922_v52  ;;  %675 = vmatpush.bf16.xpose.msra.mxu2 %v666_v57 }
 0x1ef   : > { %811 = vmatpush.bf16.xpose.msrb.mxu1 %v666_v57 }
 0x1f4   : > { %v940_v59 = vpop.permute.xlu1 %939 }
 0x1f5   : > { %v945_v60 = vsel %vm637_vm9, %v940_v59, 0  ;;  %1624 = vmatmul.msk.bf16.vlgmr.msra.gmra.mxu2 %vm637_vm9, %v630_v48 }
 0x1f6   : > { %1079 = vmatpush.bf16.xpose.msrb.mxu0 %v922_v52 }
 0x1f7   : > { %954 = vmatpush.bf16.xpose.msra.mxu1 %v945_v60 }
 0x1fc   : > { %v938_v63 = vpop.permute.xlu1 %937 }
 0x1fd   : > { %1628 = vmatmul.msk.bf16.vlgmr.msrb.gmra.mxu1 %vm637_vm9, %v800_v58  ;;  %1631 = vmatmul.msk.bf16.vlgmr.msra.gmra.mxu0 %vm637_vm9, %v915_v61 }
 0x1ff   : > { %1097 = vmatpush.bf16.xpose.msrb.mxu1 %v945_v60 }
 0x204   : > { %v1086_v0 = vpop.permute.xlu1 %1085 }
 0x20d   : > { %1632 = vmatmul.msk.bf16.vlgmr.msra.gmra.mxu1 %vm637_vm9, %v938_v63  ;;  %1635 = vmatmul.msk.bf16.vlgmr.msrb.gmra.mxu0 %vm637_vm9, %v1068_v62 }
 0x21d   : > { %1636 = vmatmul.msk.bf16.vlgmr.msrb.gmra.mxu1 %vm637_vm9, %v1086_v0 }
 0x26a   : > { %v653_v5 = vpop.f32.mrf.mxu1  ;;  %v795_v6 = vpop.f32.mrf.mxu0 }
 0x26b   : > { %v654_v7 = vadd.f32 %v653_v5, %v631_v1  ;;  %v796_v8 = vadd.f32 %v795_v6, %v780_v3 }
 0x26d   : > { %v681_v9 = vsel %vm637_vm9, %v654_v7, -inf  ;;  %v817_v10 = vsel %vm637_vm9, %v796_v8, -inf }
 0x26e   : > { %682 = vmax.xlane.f32.xlu2 %v681_v9  ;;  %818 = vmax.xlane.f32.xlu1 %v817_v10 }
 0x272   : > { %v655_v11 = vpop.f32.mrf.mxu1  ;;  %v797_v12 = vpop.f32.mrf.mxu0 }
 0x278   : > { %v677_v13 = vpop.f32.mrf.mxu2 }
 0x279   : > { %v678_v14 = vadd.f32 %v677_v13, %v631_v1 }
 0x27a   : > { %v813_v16 = vpop.f32.mrf.mxu1  ;;  %v933_v17 = vpop.f32.mrf.mxu0 }
 0x27b   : > { %v814_v18 = vadd.f32 %v813_v16, %v780_v3  ;;  %v684_v19 = vsel %vm637_vm9, %v678_v14, -inf  ;;  %v934_v22 = vadd.f32 %v933_v17, %v913_v20 }
 0x27c   : > { %685 = vmax.xlane.f32.xlu0 %v684_v19 }
 0x27d   : > { %v820_v21 = vsel %vm637_vm9, %v814_v18, -inf  ;;  %v960_v26 = vsel %vm637_vm9, %v934_v22, -inf }
 0x27e   : > { %821 = vmax.xlane.f32.xlu2 %v820_v21 }
 0x280   : > { %v679_v23 = vpop.f32.mrf.mxu2 }
 0x282   : > { %v815_v24 = vpop.f32.mrf.mxu1  ;;  %v935_v25 = vpop.f32.mrf.mxu0 }
 0x284   : > { %961 = vmax.xlane.f32.xlu0 %v960_v26 }
 0x28a   : > { %v956_v28 = vpop.f32.mrf.mxu1  ;;  %v1081_v29 = vpop.f32.mrf.mxu0 }
 0x28b   : > { %v957_v30 = vadd.f32 %v956_v28, %v913_v20  ;;  %v1082_v31 = vadd.f32 %v1081_v29, %v1066_v27 }
 0x28d   : > { %v1103_v32 = vsel %vm637_vm9, %v1082_v31, -inf  ;;  %v963_v33 = vsel %vm637_vm9, %v957_v30, -inf }
 0x28e   : > { %1104 = vmax.xlane.f32.xlu0 %v1103_v32  ;;  %964 = vmax.xlane.f32.xlu2 %v963_v33 }
 0x292   : > { %v958_v34 = vpop.f32.mrf.mxu1  ;;  %v1083_v35 = vpop.f32.mrf.mxu0 }
 0x29a   : > { %v1099_v36 = vpop.f32.mrf.mxu1 }
 0x29b   : > { %v1100_v37 = vadd.f32 %v1099_v36, %v1066_v27 }
 0x29d   : > { %v1106_v38 = vsel %vm637_vm9, %v1100_v37, -inf }
 0x29e   : > { %1107 = vmax.xlane.f32.xlu2 %v1106_v38 }
 0x2a2   : > { %731 = vrot.lane.b32.xlu0 %v2434_v46, %s2175_s2  ;;  %v1101_v39 = vpop.f32.mrf.mxu1 }
 0x2b6   : > { %753 = vrot.lane.b32.xlu2 %v2440_v50, %s2175_s2 }
 0x2e1   : > { %v683_v40 = vpop.xlane.xlu2 %682  ;;  %v819_v41 = vpop.xlane.xlu1 %818 }
 0x2e2   : > { %v687_v42 = vsub.f32 %v654_v7, %v683_v40  ;;  %v823_v43 = vsub.f32 %v796_v8, %v819_v41 }
 0x2e4   : > { %v689_v44 = vmul.f32 1.442695, %v687_v42  ;;  %v825_v45 = vmul.f32 1.442695, %v823_v43 }
 0x2e6   : > { %1817 = vpow2.f32 %v689_v44 }
 0x2e7   : > { %1819 = vpow2.f32 %v825_v45 }
 0x2ec   : > { %v2472_v47 = vpop.eup %1817 }
 0x2ed   : > { %v2474_v48 = vpop.eup %1819  ;;  %v693_v49 = vsel %vm637_vm9, %v2472_v47, 0.0 }
 0x2ee   : > { %694 = vadd.xlane.f32.xlu1 %v693_v49  ;;  %v829_v51 = vsel %vm637_vm9, %v2474_v48, 0.0 }
 0x2ef   : > { %830 = vadd.xlane.f32.xlu2 %v829_v51  ;;  %v686_v52 = vpop.xlane.xlu0 %685 }
 0x2f0   : > { %v688_v53 = vsub.f32 %v678_v14, %v686_v52 }
 0x2f1   : > { %v822_v54 = vpop.xlane.xlu2 %821 }
 0x2f2   : > { %v691_v55 = vmul.f32 1.442695, %v688_v53  ;;  %v824_v56 = vsub.f32 %v814_v18, %v822_v54 }
 0x2f4   : > { %1821 = vpow2.f32 %v691_v55  ;;  %v827_v57 = vmul.f32 1.442695, %v824_v56 }
 0x2f6   : > { %1823 = vpow2.f32 %v827_v57 }
 0x2f7   : > { %v962_v58 = vpop.xlane.xlu0 %961 }
 0x2f8   : > { %v966_v60 = vsub.f32 %v934_v22, %v962_v58 }
 0x2fa   : > { %v2480_v59 = vpop.eup %1821  ;;  %v968_v62 = vmul.f32 1.442695, %v966_v60 }
 0x2fb   : > { %v696_v61 = vsel %vm637_vm9, %v2480_v59, 0.0 }
 0x2fc   : > { %697 = vadd.xlane.f32.xlu1 %v696_v61  ;;  %v2484_v63 = vpop.eup %1823  ;;  %1825 = vpow2.f32 %v968_v62 }
 0x2fd   : > { %v832_v6 = vsel %vm637_vm9, %v2484_v63, 0.0 }
 0x301   : > { %v1105_v0 = vpop.xlane.xlu0 %1104  ;;  %v965_v1 = vpop.xlane.xlu2 %964 }
 0x302   : > { %v1109_v3 = vsub.f32 %v1082_v31, %v1105_v0  ;;  %v967_v5 = vsub.f32 %v957_v30, %v965_v1  ;;  %v2489_v9 = vpop.eup %1825 }
 0x303   : > { %v972_v10 = vsel %vm637_vm9, %v2489_v9, 0.0 }
 0x304   : > { %v970_v7 = vmul.f32 1.442695, %v967_v5  ;;  %833 = vadd.xlane.f32.xlu1 %v832_v6  ;;  %v1111_v8 = vmul.f32 1.442695, %v1109_v3 }
 0x306   : > { %1827 = vpow2.f32 %v970_v7 }
 0x307   : > { %1010 = vrot.lane.b32.xlu2 %v2434_v46, %s2176_s15  ;;  %1829 = vpow2.f32 %v1111_v8 }
 0x30c   : > { %973 = vadd.xlane.f32.xlu1 %v972_v10  ;;  %v2493_v11 = vpop.eup %1827 }
 0x30d   : > { %v975_v12 = vsel %vm637_vm9, %v2493_v11, 0.0  ;;  %v2497_v13 = vpop.eup %1829 }
 0x30e   : > { %976 = vadd.xlane.f32.xlu0 %v975_v12  ;;  %v1115_v46 = vsel %vm637_vm9, %v2497_v13, 0.0 }
 0x311   : > { %v1108_v14 = vpop.xlane.xlu2 %1107 }
 0x312   : > { %v1110_v16 = vsub.f32 %v1100_v37, %v1108_v14 }
 0x314   : > { %v1113_v17 = vmul.f32 1.442695, %v1110_v16  ;;  %1116 = vadd.xlane.f32.xlu1 %v1115_v46  ;;  %v732_v18 = vpop.permute.xlu0 %731 }
 0x315   : > { %v738_v19 = vsel %vm736_vm10, %v732_v18, 0 }
 0x316   : > { %1831 = vpow2.f32 %v1113_v17  ;;  %747 = vmatpush.bf16.msra.mxu3 %v738_v19  ;;  %877 = vmatpush.bf16.msrb.mxu2 %v738_v19 }
 0x319   : > { %v754_v20 = vpop.permute.xlu2 %753 }
 0x31a   : > { %v759_v21 = vsel %vm736_vm10, %v754_v20, 0 }
 0x31b   : > { %768 = vmatpush.bf16.msrb.mxu3 %v759_v21 }
 0x31c   : > { %v2503_v22 = vpop.eup %1831 }
 0x31d   : > { %v1118_v23 = vsel %vm637_vm9, %v2503_v22, 0.0 }
 0x31e   : > { %1119 = vadd.xlane.f32.xlu1 %v1118_v23 }
 0x337   : > { %1031 = vrot.lane.b32.xlu1 %v2440_v50, %s2176_s15 }
 0x361   : > { %v695_v24 = vpop.xlane.xlu1 %694 }
 0x362   : > { %v831_v25 = vpop.xlane.xlu2 %830  ;;  %1833 = vrcp.f32 %v695_v24  ;;  %v710_v34 = vand.u32 2147483648, %v695_v24  ;;  %v708_v37 = vand.u32 2147483647, %v695_v24  ;;  %vm704_vm13 = vweird.f32 %v695_v24 }
 0x363   : > { %1835 = vrcp.f32 %v831_v25  ;;  %v846_v35 = vand.u32 2147483648, %v831_v25  ;;  %v844_v38 = vand.u32 2147483647, %v831_v25  ;;  %vm840_vm14 = vweird.f32 %v831_v25 }
 0x364   : > { %v711_v42 = vor.u32 1.1754944e-38, %v710_v34  ;;  %vm709_vm2 = vcmp.eq.f32.partialorder %v708_v37, 8.507059e+37 }
 0x365   : > { %v847_v43 = vor.u32 1.1754944e-38, %v846_v35  ;;  %vm845_vm3 = vcmp.eq.f32.partialorder %v844_v38, 8.507059e+37 }
 0x368   : > { %v1834_v26 = vpop.eup %1833 }
 0x369   : > { %v1836_v27 = vpop.eup %1835  ;;  %v700_v28 = vmul.f32 %v1834_v26, %v695_v24  ;;  %vm705_vm11 = vweird.f32 %v1834_v26 }
 0x36a   : > { %v836_v29 = vmul.f32 %v1836_v27, %v831_v25  ;;  %v1011_v30 = vpop.permute.xlu2 %1010  ;;  %vm841_vm12 = vweird.f32 %v1836_v27  ;;  %vm706_vm15 = vmor %vm704_vm13, %vm705_vm11 }
 0x36b   : > { %v701_v31 = vsub.f32 1.0, %v700_v28  ;;  %v1016_v32 = vsel %vm736_vm10, %v1011_v30, 0  ;;  %vm842_vm0 = vmor %vm840_vm14, %vm841_vm12 }
 0x36c   : > { %v837_v33 = vsub.f32 1.0, %v836_v29  ;;  %1025 = vmatpush.bf16.msra.mxu2 %v1016_v32 }
 0x36d   : > { %v702_v36 = vmul.f32 %v1834_v26, %v701_v31 }
 0x36e   : > { %v838_v50 = vmul.f32 %v1836_v27, %v837_v33 }
 0x36f   : > { %v698_v39 = vpop.xlane.xlu1 %697  ;;  %v703_v40 = vadd.f32 %v1834_v26, %v702_v36 }
 0x370   : > { %v839_v41 = vadd.f32 %v1836_v27, %v838_v50  ;;  %1837 = vrcp.f32 %v698_v39  ;;  %v725_v62 = vand.u32 2147483648, %v698_v39  ;;  %vm719_vm5 = vweird.f32 %v698_v39 }
 0x371   : > { %v707_v44 = vsel %vm706_vm15, %v1834_v26, %v703_v40 }
 0x372   : > { %v712_v45 = vsel %vm709_vm2, %v711_v42, %v707_v44  ;;  %v843_v49 = vsel %vm842_vm0, %v1836_v27, %v839_v41  ;;  %v726_v1 = vor.u32 1.1754944e-38, %v725_v62 }
 0x373   : > { %v713_v51 = vmul.f32 %v2472_v47, %v712_v45  ;;  %v848_v52 = vsel %vm845_vm3, %v847_v43, %v843_v49  ;;  %v723_v47 = vand.u32 2147483647, %v698_v39 }
 0x374   : > { %v849_v53 = vmul.f32 %v2474_v48, %v848_v52 }
 0x375   : > { %v729_v54 = vpack.c.bf16 %v713_v51, %v713_v51  ;;  %vm724_vm7 = vcmp.eq.f32.partialorder %v723_v47, 8.507059e+37 }
 0x376   : > { %v1838_v55 = vpop.eup %1837  ;;  %v865_v56 = vpack.c.bf16 %v849_v53, %v849_v53 }
 0x377   : > { %v715_v57 = vmul.f32 %v1838_v55, %v698_v39  ;;  %1625 = vmatmul.msk.bf16.vlgmr.msra.gmra.mxu3 %vm637_vm9, %v729_v54  ;;  %v834_v58 = vpop.xlane.xlu1 %833  ;;  %vm720_vm4 = vweird.f32 %v1838_v55 }
 0x378   : > { %1629 = vmatmul.msk.bf16.vlgmr.msrb.gmra.mxu2 %vm637_vm9, %v865_v56  ;;  %893 = vmatpush.bf16.msra.mxu3 %v759_v21  ;;  %1839 = vrcp.f32 %v834_v58  ;;  %vm721_vm6 = vmor %vm719_vm5, %vm720_vm4  ;;  %v861_v20 = vand.u32 2147483648, %v834_v58  ;;  %vm855_vm11 = vweird.f32 %v834_v58  ;;  %v859_v21 = vand.u32 2147483647, %v834_v58 }
 0x379   : > { %v716_v60 = vsub.f32 1.0, %v715_v57  ;;  %1163 = vmatpush.bf16.msrb.mxu2 %v1016_v32 }
 0x37a   : > { %v862_v27 = vor.u32 1.1754944e-38, %v861_v20  ;;  %vm860_vm14 = vcmp.eq.f32.partialorder %v859_v21, 8.507059e+37 }
 0x37b   : > { %v717_v61 = vmul.f32 %v1838_v55, %v716_v60 }
 0x37d   : > { %v718_v0 = vadd.f32 %v1838_v55, %v717_v61 }
 0x37e   : > { %v1840_v48 = vpop.eup %1839 }
 0x37f   : > { %v851_v3 = vmul.f32 %v1840_v48, %v834_v58  ;;  %v974_v5 = vpop.xlane.xlu1 %973  ;;  %v722_v6 = vsel %vm721_vm6, %v1838_v55, %v718_v0  ;;  %vm856_vm8 = vweird.f32 %v1840_v48 }
 0x380   : > { %1841 = vrcp.f32 %v974_v5  ;;  %v727_v8 = vsel %vm724_vm7, %v726_v1, %v722_v6  ;;  %vm857_vm12 = vmor %vm855_vm11, %vm856_vm8  ;;  %v987_v26 = vand.u32 2147483647, %v974_v5  ;;  %vm983_vm15 = vweird.f32 %v974_v5 }
 0x381   : > { %v852_v7 = vsub.f32 1.0, %v851_v3  ;;  %v728_v10 = vmul.f32 %v2480_v59, %v727_v8  ;;  %v2514_v46 = vpop.xlane.xlu0 %976  ;;  %v989_v59 = vand.u32 2147483648, %v974_v5 }
 0x382   : > { %vm988_vm2 = vcmp.eq.f32.partialorder %v987_v26, 8.507059e+37  ;;  %v1004_v55 = vand.u32 2147483648, %v2514_v46  ;;  %vm998_vm8 = vweird.f32 %v2514_v46  ;;  %v1002_v57 = vand.u32 2147483647, %v2514_v46 }
 0x383   : > { %v853_v12 = vmul.f32 %v1840_v48, %v852_v7  ;;  %v730_v14 = vpack.c.bf16 %v728_v10, %v728_v10  ;;  %v990_v31 = vor.u32 1.1754944e-38, %v989_v59 }
 0x384   : > { %v1005_v61 = vor.u32 1.1754944e-38, %v1004_v55 }
 0x385   : > { %v854_v17 = vadd.f32 %v1840_v48, %v853_v12 }
 0x386   : > { %v1842_v16 = vpop.eup %1841 }
 0x387   : > { %v979_v18 = vmul.f32 %v1842_v16, %v974_v5  ;;  %1626 = vmatmul.msk.bf16.vlgmr.msrb.gmra.mxu3 %vm637_vm9, %v730_v14  ;;  %v1117_v19 = vpop.xlane.xlu1 %1116  ;;  %v858_v24 = vsel %vm857_vm12, %v1840_v48, %v854_v17  ;;  %vm984_vm13 = vweird.f32 %v1842_v16  ;;  %vm1003_vm12 = vcmp.eq.f32.partialorder %v1002_v57, 8.507059e+37  ;;  %v1687_v57 = vld [vmem:[%s469_s12 + $0x8] sm:$0xff] }
 0x388   : > { %1843 = vrcp.f32 %v1117_v19  ;;  %v863_v30 = vsel %vm860_vm14, %v862_v27, %v858_v24  ;;  %vm985_vm0 = vmor %vm983_vm15, %vm984_vm13  ;;  %v1132_v44 = vand.u32 2147483648, %v1117_v19  ;;  %vm1126_vm4 = vweird.f32 %v1117_v19  ;;  %1306 = vmatpush.bf16.msra.mxu1 %v1687_v57 }
 0x389   : > { %v980_v23 = vsub.f32 1.0, %v979_v18  ;;  %1845 = vrcp.f32 %v2514_v46  ;;  %v864_v36 = vmul.f32 %v2484_v63, %v863_v30  ;;  %v1130_v49 = vand.u32 2147483647, %v1117_v19 }
 0x38a   : > { %v1133_v51 = vor.u32 1.1754944e-38, %v1132_v44 }
 0x38b   : > { %v981_v25 = vmul.f32 %v1842_v16, %v980_v23  ;;  %v866_v42 = vpack.c.bf16 %v864_v36, %v864_v36  ;;  %vm1131_vm6 = vcmp.eq.f32.partialorder %v1130_v49, 8.507059e+37 }
 0x38d   : > { %v982_v28 = vadd.f32 %v1842_v16, %v981_v25 }
 0x38e   : > { %v1844_v29 = vpop.eup %1843 }
 0x38f   : > { %v1846_v32 = vpop.eup %1845  ;;  %v986_v33 = vsel %vm985_vm0, %v1842_v16, %v982_v28  ;;  %v1122_v34 = vmul.f32 %v1844_v29, %v1117_v19  ;;  %vm1127_vm3 = vweird.f32 %v1844_v29 }
 0x390   : > { %v991_v35 = vsel %vm988_vm2, %v990_v31, %v986_v33  ;;  %v994_v38 = vmul.f32 %v1846_v32, %v2514_v46  ;;  %vm1128_vm5 = vmor %vm1126_vm4, %vm1127_vm3  ;;  %vm999_vm7 = vweird.f32 %v1846_v32  ;;  %vm1062_vm2 = vcmask 191616  }
 0x391   : > { %v992_v37 = vmul.f32 %v2489_v9, %v991_v35  ;;  %v1123_v50 = vsub.f32 1.0, %v1122_v34  ;;  %v1120_v45 = vpop.xlane.xlu1 %1119  ;;  %vm1000_vm11 = vmor %vm998_vm8, %vm999_vm7  ;;  %vm1195_vm3 = vcmask 257216  }
 0x392   : > { %v995_v43 = vsub.f32 1.0, %v994_v38  ;;  %1847 = vrcp.f32 %v1120_v45  ;;  %v1147_v7 = vand.u32 2147483648, %v1120_v45  ;;  %vm1141_vm14 = vweird.f32 %v1120_v45 }
 0x393   : > { %v1124_v39 = vmul.f32 %v1844_v29, %v1123_v50  ;;  %v1008_v40 = vpack.c.bf16 %v992_v37, %v992_v37  ;;  %v1145_v8 = vand.u32 2147483647, %v1120_v45 }
 0x394   : > { %v996_v9 = vmul.f32 %v1846_v32, %v995_v43  ;;  %v1148_v12 = vor.u32 1.1754944e-38, %v1147_v7 }
 0x395   : > { %v1125_v41 = vadd.f32 %v1844_v29, %v1124_v39  ;;  %1633 = vmatmul.msk.bf16.vlgmr.msra.gmra.mxu2 %vm637_vm9, %v1008_v40  ;;  %vm1146_vm0 = vcmp.eq.f32.partialorder %v1145_v8, 8.507059e+37 }
 0x396   : > { %v997_v53 = vadd.f32 %v1846_v32, %v996_v9 }
 0x397   : > { %1630 = vmatmul.msk.bf16.vlgmr.msra.gmra.mxu3 %vm637_vm9, %v866_v42  ;;  %v1129_v63 = vsel %vm1128_vm5, %v1844_v29, %v1125_v41  ;;  %v1685_v41 = vld [vmem:[%s459_s26 + $0x8] sm:$0xff]  ;;  %v1684_v42 = vld [vmem:[%s459_s26] sm:$0xff] }
 0x398   : > { %v1134_v52 = vsel %vm1131_vm6, %v1133_v51, %v1129_v63  ;;  %v1848_v54 = vpop.eup %1847  ;;  %v1001_v58 = vsel %vm1000_vm11, %v1846_v32, %v997_v53  ;;  %1230 = vmatpush.bf16.msra.mxu0 %v1685_v41 }
 0x399   : > { %v1135_v56 = vmul.f32 %v2497_v13, %v1134_v52  ;;  %v1137_v60 = vmul.f32 %v1848_v54, %v1120_v45  ;;  %v1006_v47 = vsel %vm1003_vm12, %v1005_v61, %v1001_v58  ;;  %vm1142_vm13 = vweird.f32 %v1848_v54 }
 0x39a   : > { %v1007_v48 = vmul.f32 %v2493_v11, %v1006_v47  ;;  %vm1143_vm15 = vmor %vm1141_vm14, %vm1142_vm13 }
 0x39b   : > { %v1151_v62 = vpack.c.bf16 %v1135_v56, %v1135_v56  ;;  %v1138_v0 = vsub.f32 1.0, %v1137_v60  ;;  %v1686_v60 = vld [vmem:[%s469_s12] sm:$0xff] }
 0x39c   : > { %v1009_v5 = vpack.c.bf16 %v1007_v48, %v1007_v48  ;;  %1231 = vmatpush.bf16.msra.mxu0 %v1684_v42  ;;  %1307 = vmatpush.bf16.msra.mxu1 %v1686_v60 }
 0x39d   : > { %v1139_v3 = vmul.f32 %v1848_v54, %v1138_v0 }
 0x39f   : > { %v1140_v6 = vadd.f32 %v1848_v54, %v1139_v3 }
 0x3a1   : > { %v1144_v10 = vsel %vm1143_vm15, %v1848_v54, %v1140_v6 }
 0x3a2   : > { %v1149_v14 = vsel %vm1146_vm0, %v1148_v12, %v1144_v10 }
 0x3a3   : > { %v1150_v11 = vmul.f32 %v2503_v22, %v1149_v14 }
 0x3a5   : > { %1637 = vmatmul.msk.bf16.vlgmr.msrb.gmra.mxu2 %vm637_vm9, %v1151_v62  ;;  %v1152_v16 = vpack.c.bf16 %v1150_v11, %v1150_v11  ;;  %v1810_v11 = vld [vmem:[%s533_s13] ss:$0 sm:$0xff] }
 0x3a9   : > { %v1032_v1 = vpop.permute.xlu1 %1031 }
 0x3aa   : > { %v1037_v13 = vsel %vm736_vm10, %v1032_v1, 0  ;;  %vm776_vm10 = vcmask 60416  }
 0x3ab   : > { %1046 = vmatpush.bf16.msrb.mxu3 %v1037_v13 }
 0x3ae   : > { %1634 = vmatmul.msk.bf16.vlgmr.msrb.gmra.mxu3 %vm637_vm9, %v1009_v5 }
 0x3af   : > { %1179 = vmatpush.bf16.msra.mxu3 %v1037_v13 }
 0x3be   : > { %1638 = vmatmul.msk.bf16.vlgmr.msra.gmra.mxu3 %vm637_vm9, %v1152_v16  ;;  %vm909_vm9 = vcmask 126016  }
 0x3fa   : > { %v749_v46 = vpop.f32.mrf.mxu3 }
 0x3fb   : > { %v774_v17 = vpack.c.bf16 %v749_v46, %v749_v46  ;;  %v879_v18 = vpop.f32.mrf.mxu2 }
 0x3fc   : > { %v899_v19 = vpack.c.bf16 %v879_v18, %v879_v18 }
 0x3fd   : > { %777 = vst.msk [vmem:[#allocation3] sm:$0xf] %vm776_vm10, %v774_v17 }
 0x3fe   : > { %903 = vrot.lane.b32.xlu2 %v899_v19, %s2177_s20 }
 0x402   : > { %v751_v20 = vpop.f32.mrf.mxu3 }
 0x403   : > { %v881_v21 = vpop.f32.mrf.mxu2 }
 0x40a   : > { %v770_v23 = vpop.f32.mrf.mxu3 }
 0x40b   : > { %v775_v59 = vpack.c.bf16 %v770_v23, %v770_v23 }
 0x40d   : > { %778 = vst.msk [vmem:[#allocation3 + $0x4] sm:$0xf] %vm776_vm10, %v775_v59 }
 0x412   : > { %v772_v24 = vpop.f32.mrf.mxu3 }
 0x418   : > { %v1027_v25 = vpop.f32.mrf.mxu2 }
 0x419   : > { %v1052_v22 = vpack.c.bf16 %v1027_v25, %v1027_v25 }
 0x41a   : > { %v895_v26 = vpop.f32.mrf.mxu3 }
 0x41b   : > { %1056 = vrot.lane.b32.xlu2 %v1052_v22, %s2178_s24  ;;  %v900_v28 = vpack.c.bf16 %v895_v26, %v895_v26 }
 0x420   : > { %v1029_v27 = vpop.f32.mrf.mxu2 }
 0x422   : > { %v897_v29 = vpop.f32.mrf.mxu3 }
 0x423   : > { %905 = vrot.lane.b32.xlu2 %v900_v28, %s2177_s20 }
 0x428   : > { %v1165_v30 = vpop.f32.mrf.mxu2 }
 0x429   : > { %v1185_v31 = vpack.c.bf16 %v1165_v30, %v1165_v30 }
 0x42b   : > { %1189 = vrot.lane.b32.xlu0 %v1185_v31, %s2179_s0 }
 0x430   : > { %v1167_v32 = vpop.f32.mrf.mxu2 }
 0x431   : > { %v1048_v33 = vpop.f32.mrf.mxu3 }
 0x432   : > { %v1053_v34 = vpack.c.bf16 %v1048_v33, %v1048_v33 }
 0x434   : > { %1058 = vrot.lane.b32.xlu1 %v1053_v34, %s2178_s24 }
 0x439   : > { %v1050_v35 = vpop.f32.mrf.mxu3 }
 0x441   : > { %v1181_v36 = vpop.f32.mrf.mxu3 }
 0x442   : > { %v1186_v37 = vpack.c.bf16 %v1181_v36, %v1181_v36 }
 0x444   : > { %1191 = vrot.lane.b32.xlu2 %v1186_v37, %s2179_s0 }
 0x449   : > { %v1183_v50 = vpop.f32.mrf.mxu3 }
 0x458   : > { %v904_v38 = vpop.permute.xlu2 %903 }
 0x459   : > { %910 = vst.msk [vmem:[#allocation3] sm:$0xf] %vm909_vm9, %v904_v38 }
 0x475   : > { %v1057_v39 = vpop.permute.xlu2 %1056 }
 0x476   : > { %1063 = vst.msk [vmem:[#allocation3] sm:$0xf] %vm1062_vm2, %v1057_v39 }
 0x47d   : > { %v906_v40 = vpop.permute.xlu2 %905 }
 0x47e   : > { %911 = vst.msk [vmem:[#allocation3 + $0x4] sm:$0xf] %vm909_vm9, %v906_v40 }
 0x49d   : > { %v1190_v43 = vpop.permute.xlu0 %1189 }
 0x49e   : > { %1196 = vst.msk [vmem:[#allocation3] sm:$0xf] %vm1195_vm3, %v1190_v43  ;;  %v1192_v45 = vpop.permute.xlu2 %1191 }
 0x4a6   : > { %v1059_v44 = vpop.permute.xlu1 %1058 }
 0x4a7   : > { %1064 = vst.msk [vmem:[#allocation3 + $0x4] sm:$0xf] %vm1062_vm2, %v1059_v44 }
 0x4a8   : > { %1197 = vst.msk [vmem:[#allocation3 + $0x4] sm:$0xf] %vm1195_vm3, %v1192_v45 }
 0x4af   : > { %v1683_v49 = vld [vmem:[#allocation3] sm:$0xff] }
 0x4b0   : > { %1651 = vmatmul.msk.bf16.vlgmr.msra.gmra.mxu0 %vm550_vm1, %v1683_v49 }
 0x52d   : > { %v1233_v63 = vpop.f32.mrf.mxu0 }
 0x52e   : > { %v2541_v9 = vadd.f32 %v1233_v63, %v2412_v2 }
 0x530   : > { %v1241_v51 = vmul.f32 %v2541_v9, %v2541_v9 }
 0x532   : > { %v1243_v52 = vsel %vm550_vm1, %v1241_v51, 0.0 }
 0x533   : > { %1244 = vadd.xlane.f32.xlu1 %v1243_v52  ;;  %v1689_v52 = vld [vmem:[%s479_s21 + $0x8] sm:$0xff] }
 0x534   : > { %1390 = vmatpush.bf16.msra.mxu2 %v1689_v52 }
 0x535   : > { %v1235_v53 = vpop.f32.mrf.mxu0 }
 0x536   : > { %v2547_v54 = vadd.f32 %v1235_v53, %v2416_v4  ;;  %v1688_v53 = vld [vmem:[%s479_s21] sm:$0xff] }
 0x538   : > { %v1242_v55 = vmul.f32 %v2547_v54, %v2547_v54  ;;  %1391 = vmatpush.bf16.msra.mxu2 %v1688_v53 }
 0x53a   : > { %v1246_v56 = vsel %vm550_vm1, %v1242_v55, 0.0 }
 0x53b   : > { %1247 = vadd.xlane.f32.xlu2 %v1246_v56 }
 0x5a6   : > { %v1245_v2 = vpop.xlane.xlu1 %1244 }
 0x5a7   : > { %v1249_v58 = vmul.f32 %v1245_v2, %v2424_v15 }
 0x5a9   : > { %v1251_v61 = vadd.f32 1.1920929e-07, %v1249_v58 }
 0x5ab   : > { %1849 = vrsqrt.f32 %v1251_v61  ;;  %vm1259_vm5 = vweird.f32 %v1251_v61 }
 0x5ae   : > { %v1248_v62 = vpop.xlane.xlu2 %1247 }
 0x5af   : > { %v1250_v4 = vmul.f32 %v1248_v62, %v2424_v15 }
 0x5b1   : > { %v1850_v47 = vpop.eup %1849  ;;  %v1252_v0 = vadd.f32 1.1920929e-07, %v1250_v4 }
 0x5b2   : > { %v1254_v48 = vmul.f32 %v1850_v47, %v1251_v61  ;;  %vm1260_vm4 = vweird.f32 %v1850_v47 }
 0x5b3   : > { %1851 = vrsqrt.f32 %v1252_v0  ;;  %vm1261_vm6 = vmor %vm1259_vm5, %vm1260_vm4  ;;  %vm1269_vm8 = vweird.f32 %v1252_v0 }
 0x5b4   : > { %v1255_v1 = vmul.f32 %v1850_v47, %v1254_v48 }
 0x5b6   : > { %v1256_v3 = vmul.f32 0.5, %v1255_v1 }
 0x5b8   : > { %v1257_v13 = vsub.f32 1.5, %v1256_v3 }
 0x5b9   : > { %v1852_v5 = vpop.eup %1851 }
 0x5ba   : > { %v1264_v6 = vmul.f32 %v1852_v5, %v1252_v0  ;;  %v1258_v7 = vmul.f32 %v1850_v47, %v1257_v13  ;;  %vm1270_vm7 = vweird.f32 %v1852_v5 }
 0x5bb   : > { %vm1271_vm11 = vmor %vm1269_vm8, %vm1270_vm7 }
 0x5bc   : > { %v1265_v8 = vmul.f32 %v1852_v5, %v1264_v6  ;;  %v1262_v12 = vsel %vm1261_vm6, %v1850_v47, %v1258_v7 }
 0x5bd   : > { %v1273_v16 = vmul.f32 %v1262_v12, %v2541_v9 }
 0x5be   : > { %v1266_v10 = vmul.f32 0.5, %v1265_v8 }
 0x5bf   : > { %v1278_v18 = vmul.f32 %v1810_v11, %v1273_v16 }
 0x5c0   : > { %v1267_v14 = vsub.f32 1.5, %v1266_v10 }
 0x5c2   : > { %v1268_v15 = vmul.f32 %v1852_v5, %v1267_v14 }
 0x5c4   : > { %v1272_v46 = vsel %vm1271_vm11, %v1852_v5, %v1268_v15 }
 0x5c5   : > { %v1274_v17 = vmul.f32 %v1272_v46, %v2547_v54 }
 0x5c7   : > { %v1279_v19 = vmul.f32 %v1810_v11, %v1274_v17 }
 0x5c9   : > { %v1280_v20 = vpack.c.bf16 %v1279_v19, %v1278_v18 }
 0x5cb   : > { %1660 = vmatmul.msk.bf16.vlgmr.msra.gmra.mxu1 %vm550_vm1, %v1280_v20 }
 0x648   : > { %v1309_v21 = vpop.f32.mrf.mxu1 }
 0x649   : > { %v1661_v23 = vmul.f32 -1.442695, %v1309_v21 }
 0x64b   : > { %1853 = vpow2.f32 %v1661_v23 }
 0x650   : > { %v1311_v59 = vpop.f32.mrf.mxu1 }
 0x651   : > { %v1854_v24 = vpop.eup %1853  ;;  %v1662_v25 = vmul.f32 -1.442695, %v1311_v59 }
 0x652   : > { %v1320_v22 = vadd.f32 1.0, %v1854_v24 }
 0x653   : > { %1855 = vpow2.f32 %v1662_v25 }
 0x654   : > { %1857 = vrcp.f32 %v1320_v22  ;;  %v1333_v31 = vand.u32 2147483648, %v1320_v22  ;;  %v1331_v33 = vand.u32 2147483647, %v1320_v22  ;;  %vm1327_vm13 = vweird.f32 %v1320_v22 }
 0x656   : > { %v1334_v36 = vor.u32 1.1754944e-38, %v1333_v31  ;;  %vm1332_vm15 = vcmp.eq.f32.partialorder %v1331_v33, 8.507059e+37 }
 0x659   : > { %v1856_v26 = vpop.eup %1855 }
 0x65a   : > { %v1858_v27 = vpop.eup %1857  ;;  %v1321_v28 = vadd.f32 1.0, %v1856_v26 }
 0x65b   : > { %v1323_v29 = vmul.f32 %v1858_v27, %v1320_v22  ;;  %vm1328_vm12 = vweird.f32 %v1858_v27 }
 0x65c   : > { %1859 = vrcp.f32 %v1321_v28  ;;  %vm1329_vm14 = vmor %vm1327_vm13, %vm1328_vm12  ;;  %v1348_v41 = vand.u32 2147483648, %v1321_v28  ;;  %v1346_v43 = vand.u32 2147483647, %v1321_v28  ;;  %vm1342_vm10 = vweird.f32 %v1321_v28 }
 0x65d   : > { %v1324_v30 = vsub.f32 1.0, %v1323_v29 }
 0x65e   : > { %v1349_v45 = vor.u32 1.1754944e-38, %v1348_v41  ;;  %vm1347_vm2 = vcmp.eq.f32.partialorder %v1346_v43, 8.507059e+37 }
 0x65f   : > { %v1325_v32 = vmul.f32 %v1858_v27, %v1324_v30 }
 0x661   : > { %v1326_v34 = vadd.f32 %v1858_v27, %v1325_v32 }
 0x662   : > { %v1860_v35 = vpop.eup %1859 }
 0x663   : > { %v1330_v37 = vsel %vm1329_vm14, %v1858_v27, %v1326_v34  ;;  %v1338_v50 = vmul.f32 %v1860_v35, %v1321_v28  ;;  %vm1343_vm0 = vweird.f32 %v1860_v35 }
 0x664   : > { %v1335_v38 = vsel %vm1332_vm15, %v1334_v36, %v1330_v37  ;;  %vm1344_vm9 = vmor %vm1342_vm10, %vm1343_vm0 }
 0x665   : > { %v1352_v39 = vmul.f32 %v1335_v38, %v1309_v21  ;;  %v1339_v40 = vsub.f32 1.0, %v1338_v50 }
 0x667   : > { %v1340_v42 = vmul.f32 %v1860_v35, %v1339_v40  ;;  %1356 = vrot.lane.b32.xlu0 %v1352_v39, %s2172_s9 }
 0x669   : > { %v1341_v44 = vadd.f32 %v1860_v35, %v1340_v42 }
 0x66b   : > { %v1345_v49 = vsel %vm1344_vm9, %v1860_v35, %v1341_v44 }
 0x66c   : > { %v1350_v63 = vsel %vm1347_vm2, %v1349_v45, %v1345_v49 }
 0x66d   : > { %v1353_v51 = vmul.f32 %v1350_v63, %v1311_v59 }
 0x66f   : > { %1358 = vrot.lane.b32.xlu0 %v1353_v51, %s2172_s9 }
 0x6d9   : > { %v1357_v55 = vpop.permute.xlu0 %1356 }
 0x6da   : > { %v1362_v57 = vmul.f32 %v1357_v55, %v1309_v21 }
 0x6e1   : > { %v1359_v56 = vpop.permute.xlu0 %1358 }
 0x6e2   : > { %v1363_v2 = vmul.f32 %v1359_v56, %v1311_v59 }
 0x6e4   : > { %v1364_v58 = vpack.c.bf16 %v1363_v2, %v1362_v57 }
 0x6e6   : > { %1671 = vmatmul.msk.bf16.vlgmr.msra.gmra.mxu2 %vm550_vm1, %v1364_v58 }
 0x769   : > { %v1393_v60 = vpop.f32.mrf.mxu2 }
 0x76a   : > { %v1398_v61 = vadd.f32 %v1393_v60, %v2541_v9 }
 0x76c   : > { %1400 = vst.msk [vmem:[#allocation2] sm:$0xff] %vm550_vm1, %v1398_v61 }
 0x770   : > { %1405 = sbr.rel (%p1672_p3) target bundleno = 1911 (0x777), region = 88 }
 0x771   : > { %v1395_v62 = vpop.f32.mrf.mxu2 }
 0x772   : > { %v1399_v4 = vadd.f32 %v1395_v62, %v2547_v54 }
 0x774   : > { %1401 = vst.msk [vmem:[#allocation2 + $0x8] sm:$0xff] %vm550_vm1, %v1399_v4 }
 0x775   : > { %1406 = vst.msk [vmem:[#allocation14] sm:$0xff] %vm550_vm1, %v1398_v61 }
 0x776   : > { %1407 = vst.msk [vmem:[#allocation14 + $0x8] sm:$0xff] %vm550_vm1, %v1399_v4 }
 0x777 PF: > { %p1740_p4 = scmp.eq.s32.totalorder %s2256_s11, 1  ;;  %s1418_s19 = sshll.u32 %s2611_s8, 4  ;;  %s1419_s19 = int_to_ptr.hbm [resolvable:$true] %s1418_s19 }
 0x778   : > { %s2180_s22 = smov [#allocation14]   ;;  %s2181_s13 = smov 128  }
 0x779   : > { %s1416_s25 = sshll.u32 %s2180_s22, 4  ;;  %s1417_s25 = int_to_ptr.vmem [resolvable:$true] %s1416_s25 }
 0x77a   : > { %1709 = dma.vmem_to_hbm [thread:$0]  (%p1740_p4), %s1417_s25, 256, %s1419_s19, [#allocation6], %s2181_s13, %s2181_s13, %s2177_s20  }
 0x77b   : > { %2136 = dma.done.wait (%p1740_p4), [#allocation6], 256  }
 0x77c   : > { %2138 = vsyncadd (%p1740_p4), [#allocation6], 4294967040 }
 0x77d PF: > { %s21_s10 = sadd.s32 1, %s2161_s10   ;;  %s2637_s30 = sld [smem:[#allocation19_spill]] }
 0x77e   : > { %p18_p5 = scmp.ge.s32.totalorder %s21_s10, 4   ;;  %s2638_s9 = sld [smem:[#allocation20_spill]] }
 0x77f   : > { %s2639_s27 = smov %s2145_s28  ;;  %s2640_s28 = smov %s2149_s29 }
 0x780   : > { %s2641_s29 = smov %s2309_s17  ;;  %20 = sbr.rel (!%p18_p5) target bundleno = 12 (0xc), region = 156 }
 0x785   :  { %1435 = vsyncpa [#allocation5], 1 }
 0x786   :  { %1437 = vsyncpa [#allocation5 + $0x1], 1 }
 0x787   :  { %1438 = vsyncpa [#allocation8], 1 }
 0x788   :  { %1439 = vsyncpa [#allocation6], 1 }
 0x789   :  { %1441 = vsyncpa [#allocation6 + $0x1], 1 }

</bundles_post_ra>
